<compile_context>
chip_gen: v7x
topology: tpu7x:2x2x1
jax: 0.10.0
libtpu: 0.0.40
codegen_flags: <defaults>
</compile_context>

<pallas_src>
import math
import functools

import jax
import jax.numpy as jnp
from jax import lax
from jax.experimental import pallas as pl
from jax.experimental.pallas import tpu as pltpu


def _round_up(v: int, m: int) -> int:
    return ((v + m - 1) // m) * m


def _cdiv(a: int, b: int) -> int:
    return (a + b - 1) // b


def _vmem_capacity_bytes() -> int:
    """Physical VMEM capacity; conservative 64 MiB fallback (v7x) if unqueryable."""
    try:
        cap = getattr(pltpu.get_tpu_info(), "vmem_capacity_bytes", None)
        if cap:
            return int(cap)
    except Exception:
        pass
    return 64 << 20


# --------------------------------------------------------------------------- kernel
def _lilinear_kernel(x_ref, src_ref, wt_ref, bt_ref, w_ref, b_ref, out_ref,
                     *, mxu_dtype):
    """One row-tile of the fused forward.

    x_ref:   (TM, in_pad)        src_ref: (TM, og_pad)
    wt_ref:  (og_pad, in_pad)    pre-transposed trans_src weight (resident)
    bt_ref:  (1, in_pad)         w_ref: (in_pad, out_pad) pre-transposed weight (resident)
    b_ref:   (1, out_pad)        out_ref: (TM, out_pad)
    """
    if mxu_dtype is None:
        prec = lax.Precision.HIGHEST          # true f32 matmul (multi-pass MXU)
        src_v = src_ref[...].astype(jnp.float32)
        wt_v = wt_ref[...].astype(jnp.float32)
    else:
        prec = None                           # bf16 operands -> full-rate MXU
        src_v = src_ref[...].astype(mxu_dtype)
        wt_v = wt_ref[...].astype(mxu_dtype)

    # stage 1: t_src = src @ Wt^T + bt   (Wt already transposed -> plain [M,K]@[K,N])
    t_src = lax.dot_general(
        src_v, wt_v,
        dimension_numbers=(((1,), (0,)), ((), ())),
        preferred_element_type=jnp.float32,
        precision=prec,
    ) + bt_ref[...].astype(jnp.float32)

    # elementwise modulation stays in f32 on the VPU
    trans_input = x_ref[...].astype(jnp.float32) * t_src

    # stage 2: out = trans_input @ W^T + b   (W already transposed)
    if mxu_dtype is None:
        lhs = trans_input
        w_v = w_ref[...].astype(jnp.float32)
    else:
        lhs = trans_input.astype(mxu_dtype)
        w_v = w_ref[...].astype(mxu_dtype)

    out = lax.dot_general(
        lhs, w_v,
        dimension_numbers=(((1,), (0,)), ((), ())),
        preferred_element_type=jnp.float32,
        precision=prec,
    ) + b_ref[...].astype(jnp.float32)

    out_ref[...] = out.astype(out_ref.dtype)


# --------------------------------------------------------------------- param caching
def prepare_params(weight, bias, wt_weight, wt_bias, *, lane: int = 128):
    """One-time padding + transposition of the parameters (cache the result).

    weight:    [out_features, in_features]   bias:    [out_features]
    wt_weight: [in_features, origin_infeat]  wt_bias: [in_features]
    """
    out_feat, in_feat = weight.shape
    in_feat2, origin_infeat = wt_weight.shape
    assert in_feat2 == in_feat

    in_pad = _round_up(in_feat, lane)
    og_pad = _round_up(origin_infeat, lane)
    out_pad = _round_up(out_feat, lane)

    def _pad2(a, rows, cols):
        if a.shape == (rows, cols):
            return a
        return jnp.pad(a, ((0, rows - a.shape[0]), (0, cols - a.shape[1])))

    def _pad1(a, cols):
        if a.shape[0] != cols:
            a = jnp.pad(a, (0, cols - a.shape[0]))
        return a.reshape(1, cols)

    return {
        "wt_t": _pad2(wt_weight, in_pad, og_pad).T,   # [og_pad, in_pad]
        "bt": _pad1(wt_bias, in_pad),                 # [1, in_pad]
        "w_t": _pad2(weight, out_pad, in_pad).T,      # [in_pad, out_pad]
        "b": _pad1(bias, out_pad),                    # [1, out_pad]
        "in_features": in_feat,
        "out_features": out_feat,
        "origin_infeat": origin_infeat,
        "in_pad": in_pad,
        "og_pad": og_pad,
        "out_pad": out_pad,
    }


# ---------------------------------------------------------------------------- forward
def lilinear_forward(x, src, params, *, tm: int = 512, mxu_dtype=None):
    """Fused LILinear forward.

    x: [N, in_features], src: [N, origin_infeat], params: from prepare_params().
    Returns (out [N, out_features], src).
    """
    n, in_feat = x.shape
    n2, origin_infeat = src.shape
    assert n == n2
    assert in_feat == params["in_features"]
    assert origin_infeat == params["origin_infeat"]

    in_pad, og_pad, out_pad = params["in_pad"], params["og_pad"], params["out_pad"]
    out_feat = params["out_features"]
    dtype = x.dtype
    itemsize = jnp.dtype(dtype).itemsize

    # Feature-dim padding only (zero columns are inert for both matmuls); no row padding.
    x_p = x if in_feat == in_pad else jnp.pad(x, ((0, 0), (0, in_pad - in_feat)))
    src_p = src if origin_infeat == og_pad else jnp.pad(
        src, ((0, 0), (0, og_pad - origin_infeat)))

    # ------------- VMEM budget -> tile_m --------------------------------------------
    cap = _vmem_capacity_bytes()
    headroom = 8 << 20
    resident_bytes = (og_pad * in_pad + in_pad * out_pad + in_pad + out_pad) * itemsize
    per_row_bytes = (
        2 * (in_pad + og_pad + out_pad) * itemsize   # double-buffered x/src/out tiles
        + 2 * in_pad * 4                             # f32 intermediates (t_src, trans_input)
    )
    avail = cap - headroom - resident_bytes
    tile_cap = (avail // per_row_bytes) if avail > 0 else 0
    tile_cap = max(8, (tile_cap // 8) * 8)
    tile_m = max(8, min(_round_up(tm, 8), tile_cap, _round_up(n, 8)))
    # Ensure >= 2 grid steps when possible so megacore (v7x) can shard the row axis.
    if _cdiv(n, tile_m) == 1 and n > 8:
        tile_m = max(8, _round_up(_cdiv(n, 2), 8))
    grid = (_cdiv(n, tile_m),)

    vmem_limit = int(resident_bytes + tile_m * per_row_bytes + headroom)
    vmem_limit = max(vmem_limit, 32 << 20)
    vmem_limit = min(vmem_limit, int(cap * 0.9))

    kernel = functools.partial(_lilinear_kernel, mxu_dtype=mxu_dtype)

    def _run(use_single_buffer_residents: bool):
        if use_single_buffer_residents:
            res_kw = {"pipeline_mode": pl.Buffered(1)}   # constant index -> one buffer
        else:
            res_kw = {}
        in_specs = [
            pl.BlockSpec((tile_m, in_pad), lambda i: (i, 0)),            # x row tile
            pl.BlockSpec((tile_m, og_pad), lambda i: (i, 0)),            # src row tile
            pl.BlockSpec((og_pad, in_pad), lambda i: (0, 0), **res_kw),  # Wt^T (resident)
            pl.BlockSpec((1, in_pad), lambda i: (0, 0), **res_kw),       # bt   (resident)
            pl.BlockSpec((in_pad, out_pad), lambda i: (0, 0), **res_kw), # W^T  (resident)
            pl.BlockSpec((1, out_pad), lambda i: (0, 0), **res_kw),      # b    (resident)
        ]
        return pl.pallas_call(
            kernel,
            out_shape=jax.ShapeDtypeStruct((n, out_pad), dtype),
            grid=grid,
            in_specs=in_specs,
            out_specs=pl.BlockSpec((tile_m, out_pad), lambda i: (i, 0)),
            compiler_params=pltpu.CompilerParams(
                dimension_semantics=("parallel",),
                vmem_limit_bytes=vmem_limit,
            ),
        )(x_p, src_p, params["wt_t"], params["bt"], params["w_t"], params["b"])

    try:
        out_p = _run(True)
    except Exception:
        # Fallback for runtimes where pipeline_mode=pl.Buffered(1) is not accepted.
        out_p = _run(False)

    out = out_p if out_pad == out_feat else out_p[:, :out_feat]
    return out, src


# --------------------------------------------------------------------------- helpers
def init_params(key, in_features, out_features, origin_infeat, dtype=jnp.float32):
    """Deterministic parameter init mirroring the PyTorch shapes/bounds."""
    k1, k2, k3, k4 = jax.random.split(key, 4)
    bw = 1.0 / math.sqrt(in_features)
    weight = jax.random.uniform(k1, (out_features, in_features), dtype, -bw, bw)
    bias = jax.random.uniform(k2, (out_features,), dtype, -bw, bw)
    bt = 1.0 / math.sqrt(origin_infeat)
    wt_weight = jax.random.uniform(k3, (in_features, origin_infeat), dtype, -bt, bt)
    wt_bias = jax.random.uniform(k4, (in_features,), dtype, -bt, bt)
    return weight, bias, wt_weight, wt_bias


def _reference(x, src, weight, bias, wt_weight, wt_bias):
    t_src = src @ wt_weight.T + wt_bias
    trans_input = x * t_src
    out = trans_input @ weight.T + bias
    return out, src


if __name__ == "__main__":
    N = 8
    ORIGIN_INFEAT = 16
    IN_FEATURES = 32
    OUT_FEATURES = 32

    key = jax.random.PRNGKey(0)
    kx, ks, kp = jax.random.split(key, 3)

    x = jax.random.normal(kx, (N, IN_FEATURES), jnp.float32)
    src = jax.random.normal(ks, (N, ORIGIN_INFEAT), jnp.float32)
    weight, bias, wt_weight, wt_bias = init_params(
        kp, IN_FEATURES, OUT_FEATURES, ORIGIN_INFEAT
    )

    # One-time (cacheable) padding + transposition of the parameters.
    params = prepare_params(weight, bias, wt_weight, wt_bias)

    # Exact f32 path (precision=HIGHEST).
    out, src_out = lilinear_forward(x, src, params)
    out = jax.block_until_ready(out)

    ref_out, _ = _reference(x, src, weight, bias, wt_weight, wt_bias)
    assert out.shape == (N, OUT_FEATURES)
    assert jnp.allclose(out, ref_out, atol=1e-5, rtol=1e-5), "f32 mismatch vs reference"
    assert jnp.array_equal(src_out, src)

    # Fast bf16-operand path (f32 accumulation) — looser tolerance.
    out_bf16, _ = lilinear_forward(x, src, params, mxu_dtype=jnp.bfloat16)
    out_bf16 = jax.block_until_ready(out_bf16)
    assert jnp.allclose(out_bf16, ref_out, atol=5e-2, rtol=5e-2), "bf16 mismatch"

    print("KERNEL_OK")
</pallas_src>

<mosaic_0001>
module attributes {stable_mosaic.version = 11 : i64} {
  func.func @_lilinear_kernel(%arg0: i32, %arg1: memref<8x128xf32, #tpu.memory_space<vmem>>, %arg2: memref<8x128xf32, #tpu.memory_space<vmem>>, %arg3: memref<128x128xf32, #tpu.memory_space<vmem>>, %arg4: memref<1x128xf32, #tpu.memory_space<vmem>>, %arg5: memref<128x128xf32, #tpu.memory_space<vmem>>, %arg6: memref<1x128xf32, #tpu.memory_space<vmem>>, %arg7: memref<8x128xf32, #tpu.memory_space<vmem>>) attributes {dimension_semantics = [#tpu.dimension_semantics<parallel>], iteration_bounds = array<i64: 1>, scalar_prefetch = 0 : i64, scratch_operands = 0 : i64, tpu.core_type = #tpu.core_type<tc>, window_params = [{transform_indices = @transform_0, window_bounds = array<i64: 8, 128>}, {transform_indices = @transform_1, window_bounds = array<i64: 8, 128>}, {pipeline_mode = #tpu.pipeline_mode<synchronous>, transform_indices = @transform_2, window_bounds = array<i64: 128, 128>}, {pipeline_mode = #tpu.pipeline_mode<synchronous>, transform_indices = @transform_3, window_bounds = array<i64: 1, 128>}, {pipeline_mode = #tpu.pipeline_mode<synchronous>, transform_indices = @transform_4, window_bounds = array<i64: 128, 128>}, {pipeline_mode = #tpu.pipeline_mode<synchronous>, transform_indices = @transform_5, window_bounds = array<i64: 1, 128>}, {transform_indices = @transform_6, window_bounds = array<i64: 8, 128>}]} {
    %c0 = arith.constant 0 : index
    %c0_0 = arith.constant 0 : index
    %0 = vector.load %arg2[%c0, %c0_0] : memref<8x128xf32, #tpu.memory_space<vmem>>, vector<8x128xf32>
    %c0_1 = arith.constant 0 : index
    %c0_2 = arith.constant 0 : index
    %1 = vector.load %arg3[%c0_1, %c0_2] : memref<128x128xf32, #tpu.memory_space<vmem>>, vector<128x128xf32>
    %cst = arith.constant dense<0.000000e+00> : vector<8x128xf32>
    %2 = tpu.matmul %0, %1, %cst {dimension_numbers = #tpu.dot_dimension_numbers<[1], [0], [0], [1], [0, 0, 1, 1], [], []>, precision = #tpu.contract_precision<fp32>} : vector<8x128xf32>, vector<128x128xf32>, vector<8x128xf32> -> vector<8x128xf32>
    %c0_3 = arith.constant 0 : index
    %c0_4 = arith.constant 0 : index
    %3 = vector.load %arg4[%c0_3, %c0_4] : memref<1x128xf32, #tpu.memory_space<vmem>>, vector<1x128xf32>
    %4 = vector.broadcast %3 : vector<1x128xf32> to vector<8x128xf32>
    %5 = arith.addf %2, %4 : vector<8x128xf32>
    %c0_5 = arith.constant 0 : index
    %c0_6 = arith.constant 0 : index
    %6 = vector.load %arg1[%c0_5, %c0_6] : memref<8x128xf32, #tpu.memory_space<vmem>>, vector<8x128xf32>
    %7 = arith.mulf %6, %5 : vector<8x128xf32>
    %c0_7 = arith.constant 0 : index
    %c0_8 = arith.constant 0 : index
    %8 = vector.load %arg5[%c0_7, %c0_8] : memref<128x128xf32, #tpu.memory_space<vmem>>, vector<128x128xf32>
    %cst_9 = arith.constant dense<0.000000e+00> : vector<8x128xf32>
    %9 = tpu.matmul %7, %8, %cst_9 {dimension_numbers = #tpu.dot_dimension_numbers<[1], [0], [0], [1], [0, 0, 1, 1], [], []>, precision = #tpu.contract_precision<fp32>} : vector<8x128xf32>, vector<128x128xf32>, vector<8x128xf32> -> vector<8x128xf32>
    %c0_10 = arith.constant 0 : index
    %c0_11 = arith.constant 0 : index
    %10 = vector.load %arg6[%c0_10, %c0_11] : memref<1x128xf32, #tpu.memory_space<vmem>>, vector<1x128xf32>
    %11 = vector.broadcast %10 : vector<1x128xf32> to vector<8x128xf32>
    %12 = arith.addf %9, %11 : vector<8x128xf32>
    %c0_12 = arith.constant 0 : index
    %c0_13 = arith.constant 0 : index
    %13 = vector.load %arg7[%c0_12, %c0_13] : memref<8x128xf32, #tpu.memory_space<vmem>>, vector<8x128xf32>
    tpu.vector_store %arg7[%c0_12, %c0_13], %12 {strides = array<i32>} : memref<8x128xf32, #tpu.memory_space<vmem>>, vector<8x128xf32>,
    return
  }
  func.func @transform_0(%arg0: i32) -> (i32, i32) {
    %c0_i32 = arith.constant 0 : i32
    %c0_i32_0 = arith.constant 0 : i32
    return %arg0, %c0_i32 : i32, i32
  }
  func.func @transform_1(%arg0: i32) -> (i32, i32) {
    %c0_i32 = arith.constant 0 : i32
    %c0_i32_0 = arith.constant 0 : i32
    return %arg0, %c0_i32 : i32, i32
  }
  func.func @transform_2(%arg0: i32) -> (i32, i32) {
    %c0_i32 = arith.constant 0 : i32
    %c0_i32_0 = arith.constant 0 : i32
    %c0_i32_1 = arith.constant 0 : i32
    return %c0_i32, %c0_i32_0 : i32, i32
  }
  func.func @transform_3(%arg0: i32) -> (i32, i32) {
    %c0_i32 = arith.constant 0 : i32
    %c0_i32_0 = arith.constant 0 : i32
    %c0_i32_1 = arith.constant 0 : i32
    return %c0_i32, %c0_i32_0 : i32, i32
  }
  func.func @transform_4(%arg0: i32) -> (i32, i32) {
    %c0_i32 = arith.constant 0 : i32
    %c0_i32_0 = arith.constant 0 : i32
    %c0_i32_1 = arith.constant 0 : i32
    return %c0_i32, %c0_i32_0 : i32, i32
  }
  func.func @transform_5(%arg0: i32) -> (i32, i32) {
    %c0_i32 = arith.constant 0 : i32
    %c0_i32_0 = arith.constant 0 : i32
    %c0_i32_1 = arith.constant 0 : i32
    return %c0_i32, %c0_i32_0 : i32, i32
  }
  func.func @transform_6(%arg0: i32) -> (i32, i32) {
    %c0_i32 = arith.constant 0 : i32
    %c0_i32_0 = arith.constant 0 : i32
    return %arg0, %c0_i32 : i32, i32
  }
}

module attributes {stable_mosaic.version = 11 : i64} {
  func.func @_lilinear_kernel(%arg0: i32, %arg1: memref<8x128xf32, #tpu.memory_space<vmem>>, %arg2: memref<8x128xf32, #tpu.memory_space<vmem>>, %arg3: memref<128x128xf32, #tpu.memory_space<vmem>>, %arg4: memref<1x128xf32, #tpu.memory_space<vmem>>, %arg5: memref<128x128xf32, #tpu.memory_space<vmem>>, %arg6: memref<1x128xf32, #tpu.memory_space<vmem>>, %arg7: memref<8x128xf32, #tpu.memory_space<vmem>>) attributes {dimension_semantics = [#tpu.dimension_semantics<parallel>], iteration_bounds = array<i64: 1>, scalar_prefetch = 0 : i64, scratch_operands = 0 : i64, tpu.core_type = #tpu.core_type<tc>, window_params = [{transform_indices = @transform_0, window_bounds = array<i64: 8, 128>}, {transform_indices = @transform_1, window_bounds = array<i64: 8, 128>}, {pipeline_mode = #tpu.pipeline_mode<synchronous>, transform_indices = @transform_2, window_bounds = array<i64: 128, 128>}, {pipeline_mode = #tpu.pipeline_mode<synchronous>, transform_indices = @transform_3, window_bounds = array<i64: 1, 128>}, {pipeline_mode = #tpu.pipeline_mode<synchronous>, transform_indices = @transform_4, window_bounds = array<i64: 128, 128>}, {pipeline_mode = #tpu.pipeline_mode<synchronous>, transform_indices = @transform_5, window_bounds = array<i64: 1, 128>}, {transform_indices = @transform_6, window_bounds = array<i64: 8, 128>}]} {
    %c0 = arith.constant 0 : index
    %c0_0 = arith.constant 0 : index
    %0 = vector.load %arg2[%c0, %c0_0] : memref<8x128xf32, #tpu.memory_space<vmem>>, vector<8x128xf32>
    %c0_1 = arith.constant 0 : index
    %c0_2 = arith.constant 0 : index
    %1 = vector.load %arg3[%c0_1, %c0_2] : memref<128x128xf32, #tpu.memory_space<vmem>>, vector<128x128xf32>
    %cst = arith.constant dense<0.000000e+00> : vector<8x128xf32>
    %2 = tpu.matmul %0, %1, %cst {dimension_numbers = #tpu.dot_dimension_numbers<[1], [0], [0], [1], [0, 0, 1, 1], [], []>, precision = #tpu.contract_precision<fp32>} : vector<8x128xf32>, vector<128x128xf32>, vector<8x128xf32> -> vector<8x128xf32>
    %c0_3 = arith.constant 0 : index
    %c0_4 = arith.constant 0 : index
    %3 = vector.load %arg4[%c0_3, %c0_4] : memref<1x128xf32, #tpu.memory_space<vmem>>, vector<1x128xf32>
    %4 = vector.broadcast %3 : vector<1x128xf32> to vector<8x128xf32>
    %5 = arith.addf %2, %4 : vector<8x128xf32>
    %c0_5 = arith.constant 0 : index
    %c0_6 = arith.constant 0 : index
    %6 = vector.load %arg1[%c0_5, %c0_6] : memref<8x128xf32, #tpu.memory_space<vmem>>, vector<8x128xf32>
    %7 = arith.mulf %6, %5 : vector<8x128xf32>
    %c0_7 = arith.constant 0 : index
    %c0_8 = arith.constant 0 : index
    %8 = vector.load %arg5[%c0_7, %c0_8] : memref<128x128xf32, #tpu.memory_space<vmem>>, vector<128x128xf32>
    %cst_9 = arith.constant dense<0.000000e+00> : vector<8x128xf32>
    %9 = tpu.matmul %7, %8, %cst_9 {dimension_numbers = #tpu.dot_dimension_numbers<[1], [0], [0], [1], [0, 0, 1, 1], [], []>, precision = #tpu.contract_precision<fp32>} : vector<8x128xf32>, vector<128x128xf32>, vector<8x128xf32> -> vector<8x128xf32>
    %c0_10 = arith.constant 0 : index
    %c0_11 = arith.constant 0 : index
    %10 = vector.load %arg6[%c0_10, %c0_11] : memref<1x128xf32, #tpu.memory_space<vmem>>, vector<1x128xf32>
    %11 = vector.broadcast %10 : vector<1x128xf32> to vector<8x128xf32>
    %12 = arith.addf %9, %11 : vector<8x128xf32>
    %c0_12 = arith.constant 0 : index
    %c0_13 = arith.constant 0 : index
    %13 = vector.load %arg7[%c0_12, %c0_13] : memref<8x128xf32, #tpu.memory_space<vmem>>, vector<8x128xf32>
    tpu.vector_store %arg7[%c0_12, %c0_13], %12 {strides = array<i32>} : memref<8x128xf32, #tpu.memory_space<vmem>>, vector<8x128xf32>,
    return
  }
  func.func @transform_0(%arg0: i32) -> (i32, i32) {
    %c0_i32 = arith.constant 0 : i32
    %c0_i32_0 = arith.constant 0 : i32
    return %arg0, %c0_i32 : i32, i32
  }
  func.func @transform_1(%arg0: i32) -> (i32, i32) {
    %c0_i32 = arith.constant 0 : i32
    %c0_i32_0 = arith.constant 0 : i32
    return %arg0, %c0_i32 : i32, i32
  }
  func.func @transform_2(%arg0: i32) -> (i32, i32) {
    %c0_i32 = arith.constant 0 : i32
    %c0_i32_0 = arith.constant 0 : i32
    %c0_i32_1 = arith.constant 0 : i32
    return %c0_i32, %c0_i32_0 : i32, i32
  }
  func.func @transform_3(%arg0: i32) -> (i32, i32) {
    %c0_i32 = arith.constant 0 : i32
    %c0_i32_0 = arith.constant 0 : i32
    %c0_i32_1 = arith.constant 0 : i32
    return %c0_i32, %c0_i32_0 : i32, i32
  }
  func.func @transform_4(%arg0: i32) -> (i32, i32) {
    %c0_i32 = arith.constant 0 : i32
    %c0_i32_0 = arith.constant 0 : i32
    %c0_i32_1 = arith.constant 0 : i32
    return %c0_i32, %c0_i32_0 : i32, i32
  }
  func.func @transform_5(%arg0: i32) -> (i32, i32) {
    %c0_i32 = arith.constant 0 : i32
    %c0_i32_0 = arith.constant 0 : i32
    %c0_i32_1 = arith.constant 0 : i32
    return %c0_i32, %c0_i32_0 : i32, i32
  }
  func.func @transform_6(%arg0: i32) -> (i32, i32) {
    %c0_i32 = arith.constant 0 : i32
    %c0_i32_0 = arith.constant 0 : i32
    return %arg0, %c0_i32 : i32, i32
  }
}

</mosaic_0001>

<bundles_post_ra>
// kernel: tpu_custom_call.1
= control target key start
LH: loop header
LB: loop body
LE: loop exit
PB: predicated region body
PF: predicated region fallthrough
CT: control target
= control target key end

     0   :  { %11 = vsyncpa [#allocation3], 0  ;;  %s3074_s0 = inlined_call_operand.hbm [shape: f32[8,128], index: 0, kind: input, shape index: {}]   ;;  %s3075_s1 = inlined_call_operand.hbm [shape: f32[8,128], index: 1, kind: input, shape index: {}]   ;;  %s3076_s2 = inlined_call_operand.hbm [shape: f32[128,128], index: 2, kind: input, shape index: {}]   ;;  %s3077_s3 = inlined_call_operand.vmem [shape: f32[1,128], index: 3, kind: input, shape index: {}]   ;;  %s3078_s4 = inlined_call_operand.hbm [shape: f32[128,128], index: 4, kind: input, shape index: {}]   ;;  %s3079_s5 = inlined_call_operand.vmem [shape: f32[1,128], index: 5, kind: input, shape index: {}]   ;;  %s3080_s6 = inlined_call_operand.hbm [shape: f32[8,128], index: 6, kind: output, shape index: {}]  }
   0x1   :  { %12 = vsyncpa [#allocation6], 0 }
   0x2   :  { %13 = vsyncpa [#allocation9], 0 }
   0x3   :  { %14 = vsyncpa [#allocation4], 0  ;;  %s2488_s21 = smov [#allocation5]   ;;  %s2489_s23 = smov [#allocation2]  }
   0x4   :  { %s31_s22 = sshll.u32 %s2488_s21, 4  ;;  %s21_s24 = sshll.u32 %s2489_s23, 4  ;;  %s32_s22 = int_to_ptr.vmem [resolvable:$true] %s31_s22  ;;  %s22_s24 = int_to_ptr.vmem [resolvable:$true] %s21_s24 }
   0x5   :  { %s2370_s27 = scalar_lea.hbm %s3075_s1, 128 }
   0x6   :  { %p2371_p0 = scmp.ne.s32.totalorder %s3075_s1, %s2370_s27  ;;  %p2374_p1 = scmp.lt.u32.totalorder %s2370_s27, %s3075_s1 }
   0x8   :  { %p2376_p2 = pnand %p2374_p1, %p2371_p0 }
   0xa   :  { %2379 = shalt.err (!%p2376_p2)
}
   0xb   :  { %s2380_s8 = scalar_lea.vmem %s32_s22, 128  ;;  %p2385_p4 = scmp.lt.s32.totalorder %s32_s22, %s32_s22 }
   0xc   :  { %p2381_p3 = scmp.ne.s32.totalorder %s32_s22, %s2380_s8  ;;  %p2386_p5 = scmp.lt.s32.totalorder %s2380_s8, %s2380_s8 }
   0xe   :  { %p2387_p6 = por %p2386_p5, %p2385_p4 }
  0x10   :  { %p2388_p7 = pnand %p2387_p6, %p2381_p3 }
  0x12   :  { %2391 = shalt.err (!%p2388_p7)
}
  0x13   :  { %34 = dma.hbm_to_vmem [thread:$0]  %s3075_s1, 128, %s32_s22, [#allocation6]  }
  0x14   :  { %s2392_s13 = scalar_lea.hbm %s3074_s0, 128 }
  0x15   :  { %p2393_p8 = scmp.ne.s32.totalorder %s3074_s0, %s2392_s13  ;;  %p2396_p9 = scmp.lt.u32.totalorder %s2392_s13, %s3074_s0 }
  0x17   :  { %p2398_p10 = pnand %p2396_p9, %p2393_p8 }
  0x19   :  { %2401 = shalt.err (!%p2398_p10)
}
  0x1a   :  { %s2402_s18 = scalar_lea.vmem %s22_s24, 128  ;;  %p2407_p12 = scmp.lt.s32.totalorder %s22_s24, %s22_s24 }
  0x1b   :  { %p2403_p11 = scmp.ne.s32.totalorder %s22_s24, %s2402_s18  ;;  %p2408_p13 = scmp.lt.s32.totalorder %s2402_s18, %s2402_s18 }
  0x1d   :  { %p2409_p0 = por %p2408_p13, %p2407_p12 }
  0x1f   :  { %p2410_p1 = pnand %p2409_p0, %p2403_p11 }
  0x21   :  { %2413 = shalt.err (!%p2410_p1)
}
  0x22   :  { %24 = dma.hbm_to_vmem [thread:$0]  %s3074_s0, 128, %s22_s24, [#allocation3]  }
  0x23   :  { %s2490_s20 = smov [#allocation7]   ;;  %s2414_s25 = scalar_lea.hbm %s3076_s2, 2048 }
  0x24   :  { %s40_s21 = sshll.u32 %s2490_s20, 4  ;;  %p2415_p2 = scmp.ne.s32.totalorder %s3076_s2, %s2414_s25  ;;  %s41_s21 = int_to_ptr.vmem [resolvable:$true] %s40_s21 }
  0x25   :  { %p2418_p3 = scmp.lt.u32.totalorder %s2414_s25, %s3076_s2 }
  0x27   :  { %p2420_p4 = pnand %p2418_p3, %p2415_p2 }
  0x29   :  { %2423 = shalt.err (!%p2420_p4)
}
  0x2a   :  { %s2424_s30 = scalar_lea.vmem %s41_s21, 2048  ;;  %p2429_p6 = scmp.lt.s32.totalorder %s41_s21, %s41_s21 }
  0x2b   :  { %p2425_p5 = scmp.ne.s32.totalorder %s41_s21, %s2424_s30  ;;  %p2430_p7 = scmp.lt.s32.totalorder %s2424_s30, %s2424_s30 }
  0x2d   :  { %p2431_p8 = por %p2430_p7, %p2429_p6 }
  0x2f   :  { %p2432_p9 = pnand %p2431_p8, %p2425_p5 }
  0x31   :  { %2435 = shalt.err (!%p2432_p9)
}
  0x32   :  { %s2491_s0 = smov 128   ;;  %s2492_s24 = smov 8  }
  0x33   :  { %46 = dma.hbm_to_vmem [thread:$0]  %s3076_s2, 2048, %s41_s21, [#allocation6], %s2491_s0, %s2491_s0, %s2492_s24  }
  0x34   :  { %s2493_s9 = smov [#allocation8]   ;;  %s2436_s13 = scalar_lea.hbm %s3078_s4, 2048 }
  0x35   :  { %s54_s10 = sshll.u32 %s2493_s9, 4  ;;  %p2437_p10 = scmp.ne.s32.totalorder %s3078_s4, %s2436_s13  ;;  %s55_s10 = int_to_ptr.vmem [resolvable:$true] %s54_s10 }
  0x36   :  { %p2440_p11 = scmp.lt.u32.totalorder %s2436_s13, %s3078_s4 }
  0x38   :  { %p2442_p12 = pnand %p2440_p11, %p2437_p10 }
  0x3a   :  { %2445 = shalt.err (!%p2442_p12)
}
  0x3b   :  { %s2446_s18 = scalar_lea.vmem %s55_s10, 2048  ;;  %p2451_p0 = scmp.lt.s32.totalorder %s55_s10, %s55_s10 }
  0x3c   :  { %p2447_p13 = scmp.ne.s32.totalorder %s55_s10, %s2446_s18  ;;  %p2452_p1 = scmp.lt.s32.totalorder %s2446_s18, %s2446_s18 }
  0x3e   :  { %p2453_p2 = por %p2452_p1, %p2451_p0 }
  0x40   :  { %p2454_p3 = pnand %p2453_p2, %p2447_p13 }
  0x42   :  { %2457 = shalt.err (!%p2454_p3)
}
  0x43   :  { %60 = dma.hbm_to_vmem [thread:$0]  %s3078_s4, 2048, %s55_s10, [#allocation9], %s2491_s0, %s2491_s0, %s2492_s24  }
  0x44   :  { %2480 = dma.done.wait [#allocation3], 128  }
  0x45   :  { %2481 = vsyncadd [#allocation3], 4294967168 }
  0x46   :  { %2482 = dma.done.wait [#allocation6], 2176  }
  0x47   :  { %2483 = vsyncadd [#allocation6], 4294965120 }
  0x48   :  { %2484 = dma.done.wait [#allocation9], 2048  }
  0x49   :  { %2485 = vsyncadd [#allocation9], 4294965248  ;;  %v2494_v0 = vmov 0.0|0.0   ;;  %vm2495_vm0 = vmmov 0   ;;  %v2496_v1 = vmov 0.0   ;;  %v76_v2 = vld [vmem:[#allocation7] sm:$0xff] }
  0x4a   :  { %2050 = vmatprep.subr.bf16.mxu0 %v2494_v0  ;;  %1662 = vmatprep.mubr.msk.f32.mxu0 %vm2495_vm0, %v2496_v1  ;;  %v77_v3 = vld [vmem:[#allocation7 + $0x8] sm:$0xff]  ;;  %v78_v4 = vld [vmem:[#allocation7 + $0x10] sm:$0xff]  ;;  %v100_v5 = vand.u32 4294901760, %v76_v2  ;;  %v79_v7 = vld [vmem:[#allocation7 + $0x18] sm:$0xff]  ;;  %s2497_s21 = smov [#allocation10]  }
  0x4b   :  { %2194 = vmatprep.subr.bf16.mxu1 %v2494_v0  ;;  %1872 = vmatprep.mubr.msk.f32.mxu1 %vm2495_vm0, %v2496_v1  ;;  %v103_v6 = vand.u32 4294901760, %v77_v3  ;;  %v106_v8 = vand.u32 4294901760, %v78_v4  ;;  %v109_v9 = vand.u32 4294901760, %v79_v7  ;;  %v80_v10 = vld [vmem:[#allocation7 + $0x20] sm:$0xff]  ;;  %v81_v11 = vld [vmem:[#allocation7 + $0x28] sm:$0xff]  ;;  %v82_v16 = vld [vmem:[#allocation7 + $0x30] sm:$0xff] }
  0x4c   :  { %v112_v14 = vand.u32 4294901760, %v80_v10  ;;  %v115_v15 = vand.u32 4294901760, %v81_v11  ;;  %v83_v17 = vld [vmem:[#allocation7 + $0x38] sm:$0xff]  ;;  %v118_v19 = vand.u32 4294901760, %v82_v16  ;;  %v84_v21 = vld [vmem:[#allocation7 + $0x40] sm:$0xff]  ;;  %v85_v22 = vld [vmem:[#allocation7 + $0x48] sm:$0xff]  ;;  %v2597_v24 = vsub.f32 %v76_v2, %v100_v5 }
  0x4d   :  { %v2587_v12 = vpack.c.bf16 %v103_v6, %v100_v5  ;;  %v2590_v13 = vpack.c.bf16 %v109_v9, %v106_v8  ;;  %v121_v20 = vand.u32 4294901760, %v83_v17  ;;  %v75_v23 = vld [vmem:[#allocation5] sm:$0xff]  ;;  %v2599_v25 = vsub.f32 %v77_v3, %v103_v6  ;;  %v86_v29 = vld [vmem:[#allocation7 + $0x50] sm:$0xff]  ;;  %v88_v32 = vld [vmem:[#allocation7 + $0x60] sm:$0xff]  ;;  %s1413_s22 = sshll.u32 %s2497_s21, 4  ;;  %s1414_s22 = int_to_ptr.vmem [resolvable:$true] %s1413_s22 }
  0x4e   :  { %v2594_v18 = vpack.c.bf16 %v115_v15, %v112_v14  ;;  %v124_v27 = vand.u32 4294901760, %v84_v21  ;;  %v127_v28 = vand.u32 4294901760, %v85_v22  ;;  %v87_v30 = vld [vmem:[#allocation7 + $0x58] sm:$0xff]  ;;  %v2605_v31 = vand.u32 4294901760, %v75_v23  ;;  %v89_v35 = vld [vmem:[#allocation7 + $0x68] sm:$0xff]  ;;  %v90_v36 = vld [vmem:[#allocation7 + $0x70] sm:$0xff]  ;;  %p2463_p5 = scmp.lt.s32.totalorder %s1414_s22, %s1414_s22 }
  0x4f   :  { %2052 = vmatpush3.bf16.msra.mxu0 %v2587_v12  ;;  %v2602_v26 = vpack.c.bf16 %v121_v20, %v118_v19  ;;  %v2607_v33 = vsub.f32 %v78_v4, %v106_v8  ;;  %v130_v34 = vand.u32 4294901760, %v86_v29  ;;  %v91_v37 = vld [vmem:[#allocation7 + $0x78] sm:$0xff]  ;;  %v133_v39 = vand.u32 4294901760, %v87_v30  ;;  %s2458_s23 = scalar_lea.vmem %s1414_s22, 128 }
  0x50   :  { %2053 = vmatprep.subr.bf16.mxu0 %v2494_v0  ;;  %v2610_v38 = vpack.c.bf16 %v127_v28, %v124_v27  ;;  %v193_v40 = vand.u32 4294901760, %v2597_v24  ;;  %v200_v41 = vand.u32 4294901760, %v2599_v25  ;;  %v2614_v42 = vsub.f32 %v79_v7, %v109_v9  ;;  %p2459_p4 = scmp.ne.s32.totalorder %s1414_s22, %s2458_s23  ;;  %p2464_p6 = scmp.lt.s32.totalorder %s2458_s23, %s2458_s23 }
  0x51   :  { %v2616_v43 = vsub.f32 %v80_v10, %v112_v14  ;;  %v2618_v44 = vsub.f32 %v81_v11, %v115_v15  ;;  %v2622_v45 = vsub.f32 %v75_v23, %v2605_v31  ;;  %v136_v46 = vand.u32 4294901760, %v88_v32 }
  0x52   :  { %v139_v47 = vand.u32 4294901760, %v89_v35  ;;  %v142_v48 = vand.u32 4294901760, %v90_v36  ;;  %v145_v49 = vand.u32 4294901760, %v91_v37  ;;  %v2624_v50 = vsub.f32 %v82_v16, %v118_v19  ;;  %p2465_p7 = por %p2464_p6, %p2463_p5 }
  0x53   :  { %2055 = vmatpush3.bf16.msra.mxu0 %v2590_v13  ;;  %v2626_v51 = vsub.f32 %v83_v17, %v121_v20  ;;  %v2628_v52 = vsub.f32 %v84_v21, %v124_v27  ;;  %v207_v53 = vand.u32 4294901760, %v2607_v33  ;;  %v2632_v54 = vsub.f32 %v85_v22, %v127_v28 }
  0x54   :  { %2056 = vmatprep.subr.bf16.mxu0 %v2494_v0  ;;  %v2634_v55 = vpack.c.bf16 %v133_v39, %v130_v34  ;;  %v194_v56 = vsub.f32 %v2597_v24, %v193_v40  ;;  %v201_v57 = vsub.f32 %v2599_v25, %v200_v41  ;;  %v2639_v58 = vsub.f32 %v86_v29, %v130_v34  ;;  %p2466_p8 = pnand %p2465_p7, %p2459_p4 }
  0x55   :  { %v2641_v59 = vsub.f32 %v87_v30, %v133_v39  ;;  %v2643_v60 = vsub.f32 %v88_v32, %v136_v46  ;;  %v182_v61 = vand.u32 4294901760, %v2622_v45  ;;  %v2646_v62 = vpack.c.bf16 %v139_v47, %v136_v46 }
  0x56   :  { %v2648_v63 = vsub.f32 %v89_v35, %v139_v47  ;;  %v2650_v2 = vpack.c.bf16 %v145_v49, %v142_v48  ;;  %v2652_v3 = vsub.f32 %v90_v36, %v142_v48  ;;  %v2654_v4 = vsub.f32 %v91_v37, %v145_v49 }
  0x57   :  { %2058 = vmatpush3.bf16.msra.mxu0 %v2594_v18  ;;  %v208_v5 = vsub.f32 %v2607_v33, %v207_v53  ;;  %v214_v6 = vand.u32 4294901760, %v2614_v42  ;;  %v221_v7 = vand.u32 4294901760, %v2616_v43  ;;  %v195_v8 = vand.u32 4294901760, %v194_v56 }
  0x58   :  { %2059 = vmatprep.subr.bf16.mxu0 %v2494_v0  ;;  %v202_v9 = vand.u32 4294901760, %v201_v57  ;;  %v228_v10 = vand.u32 4294901760, %v2618_v44  ;;  %v235_v11 = vand.u32 4294901760, %v2624_v50  ;;  %v183_v14 = vsub.f32 %v2622_v45, %v182_v61 }
  0x59   :  { %v242_v15 = vand.u32 4294901760, %v2626_v51  ;;  %v249_v16 = vand.u32 4294901760, %v2628_v52  ;;  %v256_v17 = vand.u32 4294901760, %v2632_v54  ;;  %v263_v19 = vand.u32 4294901760, %v2639_v58 }
  0x5a   :  { %v270_v20 = vand.u32 4294901760, %v2641_v59  ;;  %v277_v21 = vand.u32 4294901760, %v2643_v60  ;;  %v284_v22 = vand.u32 4294901760, %v2648_v63  ;;  %v291_v23 = vand.u32 4294901760, %v2652_v3 }
  0x5b   :  { %2061 = vmatpush3.bf16.msra.mxu0 %v2602_v26  ;;  %v298_v27 = vand.u32 4294901760, %v2654_v4  ;;  %v2675_v28 = vpack.c.bf16 %v200_v41, %v193_v40  ;;  %v2677_v29 = vpack.c.bf16 %v214_v6, %v207_v53  ;;  %v215_v30 = vsub.f32 %v2614_v42, %v214_v6 }
  0x5c   :  { %2062 = vmatprep.subr.bf16.mxu0 %v2494_v0  ;;  %v2681_v32 = vpack.c.bf16 %v228_v10, %v221_v7  ;;  %v2683_v34 = vpack.c.bf16 %v242_v15, %v235_v11  ;;  %v2685_v35 = vpack.c.bf16 %v256_v17, %v249_v16  ;;  %v2688_v36 = vpack.c.bf16 %v270_v20, %v263_v19 }
  0x5d   :  { %v2690_v37 = vpack.c.bf16 %v284_v22, %v277_v21  ;;  %v2692_v39 = vpack.c.bf16 %v298_v27, %v291_v23  ;;  %v184_v40 = vand.u32 4294901760, %v183_v14  ;;  %v209_v41 = vand.u32 4294901760, %v208_v5 }
  0x5e   :  { %v2075_v46 = vpack.c.bf16 %v202_v9, %v195_v8  ;;  %v216_v47 = vand.u32 4294901760, %v215_v30  ;;  %v222_v48 = vsub.f32 %v2616_v43, %v221_v7  ;;  %v229_v49 = vsub.f32 %v2618_v44, %v228_v10 }
  0x5f   :  { %2064 = vmatpush3.bf16.msra.mxu0 %v2610_v38  ;;  %v236_v53 = vsub.f32 %v2624_v50, %v235_v11  ;;  %v243_v14 = vsub.f32 %v2626_v51, %v242_v15  ;;  %v250_v5 = vsub.f32 %v2628_v52, %v249_v16  ;;  %v257_v10 = vsub.f32 %v2632_v54, %v256_v17 }
  0x60   :  { %2065 = vmatprep.subr.bf16.mxu0 %v2494_v0  ;;  %v2078_v56 = vpack.c.bf16 %v216_v47, %v209_v41  ;;  %v223_v57 = vand.u32 4294901760, %v222_v48  ;;  %v230_v6 = vand.u32 4294901760, %v229_v49  ;;  %v264_v15 = vsub.f32 %v2639_v58, %v263_v19 }
  0x61   :  { %v237_v8 = vand.u32 4294901760, %v236_v53  ;;  %v244_v9 = vand.u32 4294901760, %v243_v14  ;;  %v251_v11 = vand.u32 4294901760, %v250_v5  ;;  %v271_v41 = vsub.f32 %v2641_v59, %v270_v20  ;;  %v744_v5 = vld [vmem:[#allocation8 + $0x10] sm:$0xff] }
  0x62   :  { %v2081_v7 = vpack.c.bf16 %v230_v6, %v223_v57  ;;  %v278_v16 = vsub.f32 %v2643_v60, %v277_v21  ;;  %v265_v47 = vand.u32 4294901760, %v264_v15  ;;  %v285_v17 = vsub.f32 %v2648_v63, %v284_v22 }
  0x63   :  { %2067 = vmatpush3.bf16.msra.mxu0 %v2634_v55  ;;  %v2084_v30 = vpack.c.bf16 %v244_v9, %v237_v8  ;;  %v272_v48 = vand.u32 4294901760, %v271_v41  ;;  %v292_v19 = vsub.f32 %v2652_v3, %v291_v23  ;;  %v299_v20 = vsub.f32 %v2654_v4, %v298_v27  ;;  %v742_v23 = vld [vmem:[#allocation8] sm:$0xff]  ;;  %v743_v27 = vld [vmem:[#allocation8 + $0x8] sm:$0xff]  ;;  %v748_v41 = vld [vmem:[#allocation8 + $0x30] sm:$0xff] }
  0x64   :  { %2068 = vmatprep.subr.bf16.mxu0 %v2494_v0  ;;  %v279_v49 = vand.u32 4294901760, %v278_v16  ;;  %v2099_v14 = vpack.c.bf16 %v2599_v25, %v2597_v24  ;;  %v766_v8 = vand.u32 4294901760, %v742_v23  ;;  %v769_v9 = vand.u32 4294901760, %v743_v27  ;;  %v747_v24 = vld [vmem:[#allocation8 + $0x28] sm:$0xff]  ;;  %v749_v16 = vld [vmem:[#allocation8 + $0x38] sm:$0xff] }
  0x65   :  { %v2090_v53 = vpack.c.bf16 %v272_v48, %v265_v47  ;;  %v293_v57 = vand.u32 4294901760, %v292_v19  ;;  %v300_v6 = vand.u32 4294901760, %v299_v20  ;;  %v781_v15 = vand.u32 4294901760, %v747_v24 }
  0x66   :  { %v2726_v47 = vpack.c.bf16 %v769_v9, %v766_v8 }
  0x67   :  { %2070 = vmatpush3.bf16.msra.mxu0 %v2646_v62  ;;  %v2096_v22 = vpack.c.bf16 %v300_v6, %v293_v57  ;;  %v2743_v20 = vsub.f32 %v747_v24, %v781_v15  ;;  %v787_v57 = vand.u32 4294901760, %v749_v16 }
  0x68   :  { %2071 = vmatprep.subr.bf16.mxu0 %v2494_v0  ;;  %2196 = vmatpush3.bf16.msra.mxu1 %v2726_v47 }
  0x69   :  { %2197 = vmatprep.subr.bf16.mxu1 %v2494_v0 }
  0x6b   :  { %2073 = vmatpush3.bf16.msra.mxu0 %v2650_v2 }
  0x6c   :  { %2074 = vmatprep.subr.bf16.mxu0 %v2494_v0 }
  0x6e   :  { %1663 = vmatmul.mubr.f32.vlgmr.msra.gmra.mrb[0].mxu0 %v184_v40  ;;  %v258_v40 = vand.u32 4294901760, %v257_v10  ;;  %v745_v10 = vld [vmem:[#allocation8 + $0x18] sm:$0xff] }
  0x6f   :  { %2076 = vmatpush3.bf16.msra.mxu0 %v2075_v46  ;;  %1697 = vmatprep.mubr.msk.f32.mxu0 %vm2495_vm0, %v2496_v1  ;;  %v775_v25 = vand.u32 4294901760, %v745_v10 }
  0x70   :  { %2077 = vmatprep.subr.bf16.mxu0 %v2494_v0  ;;  %v2087_v46 = vpack.c.bf16 %v258_v40, %v251_v11  ;;  %v772_v11 = vand.u32 4294901760, %v744_v5 }
  0x72   :  { %v2732_v48 = vsub.f32 %v744_v5, %v772_v11 }
  0x73   :  { %2079 = vmatpush3.bf16.msra.mxu0 %v2078_v56  ;;  %v286_v56 = vand.u32 4294901760, %v285_v17  ;;  %v751_v17 = vld [vmem:[#allocation8 + $0x48] sm:$0xff] }
  0x74   :  { %2080 = vmatprep.subr.bf16.mxu0 %v2494_v0 }
  0x75   :  { %v2093_v21 = vpack.c.bf16 %v286_v56, %v279_v49  ;;  %v2105_v49 = vpack.c.bf16 %v2618_v44, %v2616_v43  ;;  %v2738_v56 = vsub.f32 %v745_v10, %v775_v25  ;;  %v2749_v44 = vsub.f32 %v749_v16, %v787_v57 }
  0x76   :  { %v873_v10 = vand.u32 4294901760, %v2732_v48 }
  0x77   :  { %2082 = vmatpush3.bf16.msra.mxu0 %v2081_v7  ;;  %v2102_v7 = vpack.c.bf16 %v2614_v42, %v2607_v33  ;;  %v2728_v33 = vsub.f32 %v742_v23, %v766_v8  ;;  %v2730_v42 = vsub.f32 %v743_v27, %v769_v9  ;;  %v2108_v27 = vpack.c.bf16 %v2626_v51, %v2624_v50 }
  0x78   :  { %2083 = vmatprep.subr.bf16.mxu0 %v2494_v0  ;;  %v2114_v50 = vpack.c.bf16 %v2641_v59, %v2639_v58  ;;  %v755_v58 = vld [vmem:[#allocation8 + $0x68] sm:$0xff]  ;;  %v874_v24 = vsub.f32 %v2732_v48, %v873_v10 }
  0x79   :  { %v805_v59 = vand.u32 4294901760, %v755_v58 }
  0x7b   :  { %2085 = vmatpush3.bf16.msra.mxu0 %v2084_v30  ;;  %v746_v30 = vld [vmem:[#allocation8 + $0x20] sm:$0xff] }
  0x7c   :  { %2086 = vmatprep.subr.bf16.mxu0 %v2494_v0  ;;  %v778_v40 = vand.u32 4294901760, %v746_v30 }
  0x7e   :  { %v2740_v19 = vsub.f32 %v746_v30, %v778_v40  ;;  %v2758_v5 = vpack.c.bf16 %v781_v15, %v778_v40  ;;  %v875_v15 = vand.u32 4294901760, %v874_v24 }
  0x7f   :  { %2088 = vmatpush3.bf16.msra.mxu0 %v2087_v46  ;;  %v750_v46 = vld [vmem:[#allocation8 + $0x40] sm:$0xff] }
  0x80   :  { %2089 = vmatprep.subr.bf16.mxu0 %v2494_v0  ;;  %v790_v6 = vand.u32 4294901760, %v750_v46  ;;  %v887_v16 = vand.u32 4294901760, %v2740_v19 }
  0x83   :  { %2091 = vmatpush3.bf16.msra.mxu0 %v2090_v53  ;;  %v2736_v53 = vpack.c.bf16 %v775_v25, %v772_v11  ;;  %v880_v11 = vand.u32 4294901760, %v2738_v56 }
  0x84   :  { %2092 = vmatprep.subr.bf16.mxu0 %v2494_v0 }
  0x85   :  { %2199 = vmatpush3.bf16.msra.mxu1 %v2736_v53  ;;  %v881_v25 = vsub.f32 %v2738_v56, %v880_v11 }
  0x86   :  { %2200 = vmatprep.subr.bf16.mxu1 %v2494_v0 }
  0x87   :  { %2094 = vmatpush3.bf16.msra.mxu0 %v2093_v21  ;;  %v784_v21 = vand.u32 4294901760, %v748_v41 }
  0x88   :  { %2095 = vmatprep.subr.bf16.mxu0 %v2494_v0 }
  0x89   :  { %v2747_v43 = vsub.f32 %v748_v41, %v784_v21  ;;  %2202 = vmatpush3.bf16.msra.mxu1 %v2758_v5  ;;  %v2765_v8 = vpack.c.bf16 %v787_v57, %v784_v21  ;;  %v882_v41 = vand.u32 4294901760, %v881_v25 }
  0x8a   :  { %2203 = vmatprep.subr.bf16.mxu1 %v2494_v0 }
  0x8b   :  { %2097 = vmatpush3.bf16.msra.mxu0 %v2096_v22  ;;  %v793_v22 = vand.u32 4294901760, %v751_v17 }
  0x8c   :  { %2098 = vmatprep.subr.bf16.mxu0 %v2494_v0 }
  0x8d   :  { %v2753_v23 = vsub.f32 %v751_v17, %v793_v22  ;;  %2205 = vmatpush3.bf16.msra.mxu1 %v2765_v8  ;;  %v2772_v51 = vpack.c.bf16 %v793_v22, %v790_v6  ;;  %v2887_v17 = vpack.c.bf16 %v882_v41, %v875_v15  ;;  %v901_v22 = vand.u32 4294901760, %v2747_v43 }
  0x8e   :  { %1698 = vmatmul.mubr.f32.vlgmr.msra.gmra.mrb[0].mxu0 %v2605_v31  ;;  %2206 = vmatprep.subr.bf16.mxu1 %v2494_v0 }
  0x8f   :  { %2100 = vmatpush3.bf16.msra.mxu0 %v2099_v14  ;;  %1732 = vmatprep.mubr.msk.f32.mxu0 %vm2495_vm0, %v2496_v1  ;;  %v2751_v14 = vsub.f32 %v750_v46, %v790_v6  ;;  %v894_v46 = vand.u32 4294901760, %v2743_v20 }
  0x90   :  { %2101 = vmatprep.subr.bf16.mxu0 %v2494_v0 }
  0x91   :  { %2208 = vmatpush3.bf16.msra.mxu1 %v2772_v51  ;;  %v895_v21 = vsub.f32 %v2743_v20, %v894_v46 }
  0x92   :  { %2209 = vmatprep.subr.bf16.mxu1 %v2494_v0 }
  0x93   :  { %2103 = vmatpush3.bf16.msra.mxu0 %v2102_v7  ;;  %v2111_v7 = vpack.c.bf16 %v2632_v54, %v2628_v52  ;;  %v2117_v52 = vpack.c.bf16 %v2648_v63, %v2643_v60  ;;  %v2120_v54 = vpack.c.bf16 %v2654_v4, %v2652_v3  ;;  %v2856_v3 = vsub.f32 %v755_v58, %v805_v59 }
  0x94   :  { %2104 = vmatprep.subr.bf16.mxu0 %v2494_v0  ;;  %v896_v6 = vand.u32 4294901760, %v895_v21 }
  0x95   :  { %v3083_v24 = vand.u32 4294901760, %v2856_v3 }
  0x97   :  { %2106 = vmatpush3.bf16.msra.mxu0 %v2105_v49  ;;  %v888_v49 = vsub.f32 %v2740_v19, %v887_v16  ;;  %v951_v41 = vsub.f32 %v2856_v3, %v3083_v24 }
  0x98   :  { %2107 = vmatprep.subr.bf16.mxu0 %v2494_v0 }
  0x99   :  { %v889_v57 = vand.u32 4294901760, %v888_v49  ;;  %v952_v21 = vand.u32 4294901760, %v951_v41 }
  0x9b   :  { %2109 = vmatpush3.bf16.msra.mxu0 %v2108_v27  ;;  %v908_v27 = vand.u32 4294901760, %v2749_v44 }
  0x9c   :  { %2110 = vmatprep.subr.bf16.mxu0 %v2494_v0 }
  0x9f   :  { %2112 = vmatpush3.bf16.msra.mxu0 %v2111_v7  ;;  %v2225_v7 = vpack.c.bf16 %v896_v6, %v889_v57 }
  0xa0   :  { %2113 = vmatprep.subr.bf16.mxu0 %v2494_v0 }
  0xa3   :  { %2115 = vmatpush3.bf16.msra.mxu0 %v2114_v50  ;;  %v902_v50 = vsub.f32 %v2747_v43, %v901_v22 }
  0xa4   :  { %2116 = vmatprep.subr.bf16.mxu0 %v2494_v0 }
  0xa7   :  { %2118 = vmatpush3.bf16.msra.mxu0 %v2117_v52  ;;  %v909_v52 = vsub.f32 %v2749_v44, %v908_v27 }
  0xa8   :  { %2119 = vmatprep.subr.bf16.mxu0 %v2494_v0 }
  0xab   :  { %2121 = vmatpush3.bf16.msra.mxu0 %v2120_v54  ;;  %v903_v54 = vand.u32 4294901760, %v902_v50 }
  0xac   :  { %2122 = vmatprep.subr.bf16.mxu0 %v2494_v0 }
  0xae   :  { %1733 = vmatmul.mubr.f32.vlgmr.msra.gmra.mrb[0].mxu0 %v2622_v45 }
  0xaf   :  { %2124 = vmatpush3.bf16.msra.mxu0 %v2587_v12  ;;  %1767 = vmatprep.mubr.msk.f32.mxu0 %vm2495_vm0, %v2496_v1 }
  0xb0   :  { %2125 = vmatprep.subr.bf16.mxu0 %v2494_v0 }
  0xb3   :  { %2127 = vmatpush3.bf16.msra.mxu0 %v2590_v13 }
  0xb4   :  { %2128 = vmatprep.subr.bf16.mxu0 %v2494_v0 }
  0xb7   :  { %2130 = vmatpush3.bf16.msra.mxu0 %v2594_v18 }
  0xb8   :  { %2131 = vmatprep.subr.bf16.mxu0 %v2494_v0 }
  0xbb   :  { %2133 = vmatpush3.bf16.msra.mxu0 %v2602_v26 }
  0xbc   :  { %2134 = vmatprep.subr.bf16.mxu0 %v2494_v0 }
  0xbf   :  { %2136 = vmatpush3.bf16.msra.mxu0 %v2610_v38 }
  0xc0   :  { %2137 = vmatprep.subr.bf16.mxu0 %v2494_v0 }
  0xc3   :  { %2139 = vmatpush3.bf16.msra.mxu0 %v2634_v55 }
  0xc4   :  { %2140 = vmatprep.subr.bf16.mxu0 %v2494_v0 }
  0xc7   :  { %2142 = vmatpush3.bf16.msra.mxu0 %v2646_v62 }
  0xc8   :  { %2143 = vmatprep.subr.bf16.mxu0 %v2494_v0 }
  0xcb   :  { %2145 = vmatpush3.bf16.msra.mxu0 %v2650_v2 }
  0xcc   :  { %2146 = vmatprep.subr.bf16.mxu0 %v2494_v0 }
  0xce   :  { %1768 = vmatmul.mubr.f32.vlgmr.msra.gmra.mrb[0].mxu0 %v182_v61  ;;  %v756_v61 = vld [vmem:[#allocation8 + $0x70] sm:$0xff] }
  0xcf   :  { %2148 = vmatpush3.bf16.msra.mxu0 %v2675_v28  ;;  %1802 = vmatprep.mubr.msk.f32.mxu0 %vm2495_vm0, %v2496_v1  ;;  %v808_v4 = vand.u32 4294901760, %v756_v61 }
  0xd0   :  { %2149 = vmatprep.subr.bf16.mxu0 %v2494_v0 }
  0xd3   :  { %2151 = vmatpush3.bf16.msra.mxu0 %v2677_v29  ;;  %v859_v29 = vand.u32 4294901760, %v2728_v33 }
  0xd4   :  { %2152 = vmatprep.subr.bf16.mxu0 %v2494_v0 }
  0xd7   :  { %2154 = vmatpush3.bf16.msra.mxu0 %v2681_v32  ;;  %v866_v32 = vand.u32 4294901760, %v2730_v42 }
  0xd8   :  { %2155 = vmatprep.subr.bf16.mxu0 %v2494_v0 }
  0xdb   :  { %2157 = vmatpush3.bf16.msra.mxu0 %v2683_v34 }
  0xdc   :  { %2158 = vmatprep.subr.bf16.mxu0 %v2494_v0 }
  0xdf   :  { %2160 = vmatpush3.bf16.msra.mxu0 %v2685_v35  ;;  %v2863_v35 = vsub.f32 %v756_v61, %v808_v4 }
  0xe0   :  { %2161 = vmatprep.subr.bf16.mxu0 %v2494_v0 }
  0xe1   :  { %v3082_v57 = vand.u32 4294901760, %v2863_v35 }
  0xe3   :  { %2163 = vmatpush3.bf16.msra.mxu0 %v2688_v36 }
  0xe4   :  { %2164 = vmatprep.subr.bf16.mxu0 %v2494_v0 }
  0xe7   :  { %2166 = vmatpush3.bf16.msra.mxu0 %v2690_v37  ;;  %v860_v37 = vsub.f32 %v2728_v33, %v859_v29 }
  0xe8   :  { %2167 = vmatprep.subr.bf16.mxu0 %v2494_v0 }
  0xe9   :  { %v861_v9 = vand.u32 4294901760, %v860_v37 }
  0xeb   :  { %2169 = vmatpush3.bf16.msra.mxu0 %v2692_v39  ;;  %v867_v39 = vsub.f32 %v2730_v42, %v866_v32 }
  0xec   :  { %2170 = vmatprep.subr.bf16.mxu0 %v2494_v0 }
  0xed   :  { %v868_v30 = vand.u32 4294901760, %v867_v39 }
  0xee   :  { %1803 = vmatmul.mubr.f32.vlgmr.msra.gmra.mrb[0].mxu0 %v2605_v31 }
  0xef   :  { %2172 = vmatpush3.bf16.msra.mxu0 %v2587_v12  ;;  %1837 = vmatprep.mubr.msk.f32.mxu0 %vm2495_vm0, %v2496_v1  ;;  %v752_v12 = vld [vmem:[#allocation8 + $0x50] sm:$0xff]  ;;  %v2883_v40 = vpack.c.bf16 %v868_v30, %v861_v9 }
  0xf0   :  { %2173 = vmatprep.subr.bf16.mxu0 %v2494_v0 }
  0xf3   :  { %2175 = vmatpush3.bf16.msra.mxu0 %v2590_v13  ;;  %v753_v13 = vld [vmem:[#allocation8 + $0x58] sm:$0xff] }
  0xf4   :  { %2176 = vmatprep.subr.bf16.mxu0 %v2494_v0 }
  0xf7   :  { %2178 = vmatpush3.bf16.msra.mxu0 %v2594_v18  ;;  %v796_v18 = vand.u32 4294901760, %v752_v12 }
  0xf8   :  { %2179 = vmatprep.subr.bf16.mxu0 %v2494_v0 }
  0xf9   :  { %v2849_v63 = vsub.f32 %v752_v12, %v796_v18  ;;  %v910_v12 = vand.u32 4294901760, %v909_v52  ;;  %v958_v52 = vsub.f32 %v2863_v35, %v3082_v57 }
  0xfb   :  { %2181 = vmatpush3.bf16.msra.mxu0 %v2602_v26  ;;  %v799_v26 = vand.u32 4294901760, %v753_v13  ;;  %v929_v61 = vand.u32 4294901760, %v2849_v63 }
  0xfc   :  { %2182 = vmatprep.subr.bf16.mxu0 %v2494_v0 }
  0xfd   :  { %v2843_v45 = vpack.c.bf16 %v799_v26, %v796_v18  ;;  %v922_v18 = vand.u32 4294901760, %v2753_v23 }
  0xff   :  { %2184 = vmatpush3.bf16.msra.mxu0 %v2610_v38  ;;  %v754_v38 = vld [vmem:[#allocation8 + $0x60] sm:$0xff]  ;;  %2211 = vmatpush3.bf16.msra.mxu1 %v2843_v45  ;;  %v923_v58 = vsub.f32 %v2753_v23, %v922_v18 }
 0x100   :  { %2185 = vmatprep.subr.bf16.mxu0 %v2494_v0  ;;  %2212 = vmatprep.subr.bf16.mxu1 %v2494_v0 }
 0x103   :  { %2187 = vmatpush3.bf16.msra.mxu0 %v2634_v55  ;;  %v802_v55 = vand.u32 4294901760, %v754_v38 }
 0x104   :  { %2188 = vmatprep.subr.bf16.mxu0 %v2494_v0 }
 0x105   :  { %v2847_v60 = vpack.c.bf16 %v805_v59, %v802_v55  ;;  %v924_v59 = vand.u32 4294901760, %v923_v58 }
 0x107   :  { %2190 = vmatpush3.bf16.msra.mxu0 %v2646_v62  ;;  %v757_v62 = vld [vmem:[#allocation8 + $0x78] sm:$0xff]  ;;  %2214 = vmatpush3.bf16.msra.mxu1 %v2847_v60 }
 0x108   :  { %2191 = vmatprep.subr.bf16.mxu0 %v2494_v0  ;;  %2215 = vmatprep.subr.bf16.mxu1 %v2494_v0  ;;  %v811_v28 = vand.u32 4294901760, %v757_v62 }
 0x10a   :  { %v2861_v34 = vpack.c.bf16 %v811_v28, %v808_v4  ;;  %v2865_v36 = vsub.f32 %v757_v62, %v811_v28  ;;  %v930_v28 = vsub.f32 %v2849_v63, %v929_v61 }
 0x10b   :  { %2193 = vmatpush3.bf16.msra.mxu0 %v2650_v2  ;;  %v2854_v2 = vsub.f32 %v754_v38, %v802_v55 }
 0x10c   :  { %2217 = vmatpush3.bf16.msra.mxu1 %v2861_v34  ;;  %v931_v39 = vand.u32 4294901760, %v930_v28  ;;  %v3081_v6 = vand.u32 4294901760, %v2865_v36  ;;  %v2249_v28 = vpack.c.bf16 %v2743_v20, %v2740_v19  ;;  %v2264_v41 = vpack.c.bf16 %v2865_v36, %v2863_v35 }
 0x10d   :  { %2218 = vmatprep.subr.bf16.mxu1 %v2494_v0  ;;  %v3084_v30 = vand.u32 4294901760, %v2854_v2  ;;  %v3087_v20 = vand.u32 4294901760, %v2854_v2 }
 0x10e   :  { %1838 = vmatmul.mubr.f32.vlgmr.msra.gmra.mrb[0].mxu0 %v2605_v31  ;;  %v2851_v31 = vsub.f32 %v753_v13, %v799_v26  ;;  %v915_v13 = vand.u32 4294901760, %v2751_v14  ;;  %v2228_v26 = vpack.c.bf16 %v910_v12, %v903_v54  ;;  %v965_v54 = vsub.f32 %v2865_v36, %v3081_v6 }
 0x10f   :  { %v944_v15 = vsub.f32 %v2854_v2, %v3084_v30  ;;  %v959_v12 = vand.u32 4294901760, %v958_v52  ;;  %v740_v52 = vld [vmem:[#allocation2] sm:$0xff] }
 0x110   :  { %v916_v38 = vsub.f32 %v2751_v14, %v915_v13  ;;  %v3085_v62 = vand.u32 4294901760, %v2851_v31 }
 0x111   :  { %v945_v49 = vand.u32 4294901760, %v944_v15  ;;  %v2261_v15 = vpack.c.bf16 %v2856_v3, %v2854_v2 }
 0x112   :  { %v917_v55 = vand.u32 4294901760, %v916_v38  ;;  %v937_v37 = vsub.f32 %v2851_v31, %v3085_v62  ;;  %v966_v38 = vand.u32 4294901760, %v965_v54 }
 0x113   :  { %v2237_v50 = vpack.c.bf16 %v952_v21, %v945_v49  ;;  %v1424_v49 = vld [vmem:[%s3077_s3] ss:$0 sm:$0xff] }
 0x114   :  { %v2231_v4 = vpack.c.bf16 %v924_v59, %v917_v55  ;;  %v938_v9 = vand.u32 4294901760, %v937_v37  ;;  %v2240_v58 = vpack.c.bf16 %v966_v38, %v959_v12  ;;  %v2243_v55 = vpack.c.bf16 %v2730_v42, %v2728_v33 }
 0x115   :  { %v2246_v59 = vpack.c.bf16 %v2738_v56, %v2732_v48  ;;  %v2252_v37 = vpack.c.bf16 %v2749_v44, %v2747_v43  ;;  %v2297_v33 = vpack.c.bf16 %v894_v46, %v887_v16  ;;  %v2300_v42 = vpack.c.bf16 %v908_v27, %v901_v22 }
 0x116   :  { %v2234_v25 = vpack.c.bf16 %v938_v9, %v931_v39  ;;  %v2255_v39 = vpack.c.bf16 %v2753_v23, %v2751_v14  ;;  %v2258_v9 = vpack.c.bf16 %v2851_v31, %v2849_v63  ;;  %v2303_v48 = vpack.c.bf16 %v922_v18, %v915_v13 }
 0x117   :  { %v3086_v56 = vand.u32 4294901760, %v2851_v31  ;;  %v3088_v43 = vand.u32 4294901760, %v2856_v3  ;;  %v3089_v14 = vand.u32 4294901760, %v2863_v35  ;;  %v3090_v23 = vand.u32 4294901760, %v2865_v36 }
 0x119   :  { %v2306_v19 = vpack.c.bf16 %v3086_v56, %v929_v61  ;;  %v2309_v44 = vpack.c.bf16 %v3088_v43, %v3087_v20 }
 0x1e1   :  { %v736_v21 = vpop.f32.mrb[0].mxu0 }
 0x1e2   :  { %v2338_v54 = vadd.f32 %v1424_v49, %v736_v21  ;;  %v1839_v12 = vpop.f32.mrb[1].mxu0 }
 0x1e4   :  { %v741_v38 = vmul.f32 %v2338_v54, %v740_v52 }
 0x1e6   :  { %v2954_v6 = vand.u32 4294901760, %v741_v38 }
 0x1e8   :  { %v847_v57 = vsub.f32 %v741_v38, %v2954_v6 }
 0x1ea   :  { %v848_v24 = vand.u32 4294901760, %v847_v57 }
 0x1ec   :  { %v849_v30 = vsub.f32 %v847_v57, %v848_v24 }
 0x1ee   :  { %v850_v62 = vand.u32 4294901760, %v849_v30 }
 0x1f0   :  { %1873 = vmatmul.mubr.f32.vlgmr.msra.gmra.mrb[0].mxu1 %v850_v62 }
 0x1f1   :  { %2220 = vmatpush3.bf16.msra.mxu1 %v2883_v40  ;;  %1907 = vmatprep.mubr.msk.f32.mxu1 %vm2495_vm0, %v2496_v1  ;;  %v2291_v40 = vpack.c.bf16 %v866_v32, %v859_v29  ;;  %v2312_v29 = vpack.c.bf16 %v3090_v23, %v3089_v14 }
 0x1f2   :  { %2221 = vmatprep.subr.bf16.mxu1 %v2494_v0 }
 0x1f5   :  { %2223 = vmatpush3.bf16.msra.mxu1 %v2887_v17  ;;  %v2294_v17 = vpack.c.bf16 %v880_v11, %v873_v10 }
 0x1f6   :  { %2224 = vmatprep.subr.bf16.mxu1 %v2494_v0 }
 0x1f9   :  { %2226 = vmatpush3.bf16.msra.mxu1 %v2225_v7 }
 0x1fa   :  { %2227 = vmatprep.subr.bf16.mxu1 %v2494_v0 }
 0x1fd   :  { %2229 = vmatpush3.bf16.msra.mxu1 %v2228_v26 }
 0x1fe   :  { %2230 = vmatprep.subr.bf16.mxu1 %v2494_v0 }
 0x201   :  { %2232 = vmatpush3.bf16.msra.mxu1 %v2231_v4 }
 0x202   :  { %2233 = vmatprep.subr.bf16.mxu1 %v2494_v0 }
 0x205   :  { %2235 = vmatpush3.bf16.msra.mxu1 %v2234_v25 }
 0x206   :  { %2236 = vmatprep.subr.bf16.mxu1 %v2494_v0 }
 0x209   :  { %2238 = vmatpush3.bf16.msra.mxu1 %v2237_v50 }
 0x20a   :  { %2239 = vmatprep.subr.bf16.mxu1 %v2494_v0 }
 0x20d   :  { %2241 = vmatpush3.bf16.msra.mxu1 %v2240_v58 }
 0x20e   :  { %2242 = vmatprep.subr.bf16.mxu1 %v2494_v0 }
 0x210   :  { %1908 = vmatmul.mubr.f32.vlgmr.msra.gmra.mrb[0].mxu1 %v2954_v6 }
 0x211   :  { %2244 = vmatpush3.bf16.msra.mxu1 %v2243_v55  ;;  %1942 = vmatprep.mubr.msk.f32.mxu1 %vm2495_vm0, %v2496_v1 }
 0x212   :  { %2245 = vmatprep.subr.bf16.mxu1 %v2494_v0 }
 0x215   :  { %2247 = vmatpush3.bf16.msra.mxu1 %v2246_v59 }
 0x216   :  { %2248 = vmatprep.subr.bf16.mxu1 %v2494_v0 }
 0x219   :  { %2250 = vmatpush3.bf16.msra.mxu1 %v2249_v28 }
 0x21a   :  { %2251 = vmatprep.subr.bf16.mxu1 %v2494_v0 }
 0x21d   :  { %2253 = vmatpush3.bf16.msra.mxu1 %v2252_v37 }
 0x21e   :  { %2254 = vmatprep.subr.bf16.mxu1 %v2494_v0 }
 0x221   :  { %2256 = vmatpush3.bf16.msra.mxu1 %v2255_v39 }
 0x222   :  { %2257 = vmatprep.subr.bf16.mxu1 %v2494_v0 }
 0x225   :  { %2259 = vmatpush3.bf16.msra.mxu1 %v2258_v9 }
 0x226   :  { %2260 = vmatprep.subr.bf16.mxu1 %v2494_v0 }
 0x229   :  { %2262 = vmatpush3.bf16.msra.mxu1 %v2261_v15 }
 0x22a   :  { %2263 = vmatprep.subr.bf16.mxu1 %v2494_v0 }
 0x22d   :  { %2265 = vmatpush3.bf16.msra.mxu1 %v2264_v41 }
 0x22e   :  { %2266 = vmatprep.subr.bf16.mxu1 %v2494_v0 }
 0x230   :  { %1943 = vmatmul.mubr.f32.vlgmr.msra.gmra.mrb[0].mxu1 %v847_v57 }
 0x231   :  { %2268 = vmatpush3.bf16.msra.mxu1 %v2726_v47  ;;  %1977 = vmatprep.mubr.msk.f32.mxu1 %vm2495_vm0, %v2496_v1 }
 0x232   :  { %2269 = vmatprep.subr.bf16.mxu1 %v2494_v0 }
 0x235   :  { %2271 = vmatpush3.bf16.msra.mxu1 %v2736_v53 }
 0x236   :  { %2272 = vmatprep.subr.bf16.mxu1 %v2494_v0 }
 0x239   :  { %2274 = vmatpush3.bf16.msra.mxu1 %v2758_v5 }
 0x23a   :  { %2275 = vmatprep.subr.bf16.mxu1 %v2494_v0 }
 0x23d   :  { %2277 = vmatpush3.bf16.msra.mxu1 %v2765_v8 }
 0x23e   :  { %2278 = vmatprep.subr.bf16.mxu1 %v2494_v0 }
 0x241   :  { %2280 = vmatpush3.bf16.msra.mxu1 %v2772_v51 }
 0x242   :  { %2281 = vmatprep.subr.bf16.mxu1 %v2494_v0 }
 0x245   :  { %2283 = vmatpush3.bf16.msra.mxu1 %v2843_v45 }
 0x246   :  { %2284 = vmatprep.subr.bf16.mxu1 %v2494_v0 }
 0x249   :  { %2286 = vmatpush3.bf16.msra.mxu1 %v2847_v60 }
 0x24a   :  { %2287 = vmatprep.subr.bf16.mxu1 %v2494_v0 }
 0x24d   :  { %2289 = vmatpush3.bf16.msra.mxu1 %v2861_v34 }
 0x24e   :  { %2290 = vmatprep.subr.bf16.mxu1 %v2494_v0 }
 0x250   :  { %1978 = vmatmul.mubr.f32.vlgmr.msra.gmra.mrb[0].mxu1 %v848_v24 }
 0x251   :  { %2292 = vmatpush3.bf16.msra.mxu1 %v2291_v40  ;;  %2012 = vmatprep.mubr.msk.f32.mxu1 %vm2495_vm0, %v2496_v1 }
 0x252   :  { %2293 = vmatprep.subr.bf16.mxu1 %v2494_v0 }
 0x255   :  { %2295 = vmatpush3.bf16.msra.mxu1 %v2294_v17 }
 0x256   :  { %2296 = vmatprep.subr.bf16.mxu1 %v2494_v0 }
 0x259   :  { %2298 = vmatpush3.bf16.msra.mxu1 %v2297_v33 }
 0x25a   :  { %2299 = vmatprep.subr.bf16.mxu1 %v2494_v0 }
 0x25d   :  { %2301 = vmatpush3.bf16.msra.mxu1 %v2300_v42 }
 0x25e   :  { %2302 = vmatprep.subr.bf16.mxu1 %v2494_v0 }
 0x261   :  { %2304 = vmatpush3.bf16.msra.mxu1 %v2303_v48 }
 0x262   :  { %2305 = vmatprep.subr.bf16.mxu1 %v2494_v0 }
 0x265   :  { %2307 = vmatpush3.bf16.msra.mxu1 %v2306_v19 }
 0x266   :  { %2308 = vmatprep.subr.bf16.mxu1 %v2494_v0 }
 0x269   :  { %2310 = vmatpush3.bf16.msra.mxu1 %v2309_v44 }
 0x26a   :  { %2311 = vmatprep.subr.bf16.mxu1 %v2494_v0 }
 0x26d   :  { %2313 = vmatpush3.bf16.msra.mxu1 %v2312_v29 }
 0x26e   :  { %2314 = vmatprep.subr.bf16.mxu1 %v2494_v0 }
 0x270   :  { %2013 = vmatmul.mubr.f32.vlgmr.msra.gmra.mrb[0].mxu1 %v2954_v6 }
 0x271   :  { %2316 = vmatpush3.bf16.msra.mxu1 %v2726_v47  ;;  %2047 = vmatprep.mubr.msk.f32.mxu1 %vm2495_vm0, %v2496_v1  ;;  %v1425_v1 = vld [vmem:[%s3079_s5] ss:$0 sm:$0xff] }
 0x272   :  { %2317 = vmatprep.subr.bf16.mxu1 %v2494_v0 }
 0x275   :  { %2319 = vmatpush3.bf16.msra.mxu1 %v2736_v53 }
 0x276   :  { %2320 = vmatprep.subr.bf16.mxu1 %v2494_v0 }
 0x279   :  { %2322 = vmatpush3.bf16.msra.mxu1 %v2758_v5 }
 0x27a   :  { %2323 = vmatprep.subr.bf16.mxu1 %v2494_v0 }
 0x27d   :  { %2325 = vmatpush3.bf16.msra.mxu1 %v2765_v8 }
 0x27e   :  { %2326 = vmatprep.subr.bf16.mxu1 %v2494_v0 }
 0x281   :  { %2328 = vmatpush3.bf16.msra.mxu1 %v2772_v51 }
 0x282   :  { %2329 = vmatprep.subr.bf16.mxu1 %v2494_v0 }
 0x285   :  { %2331 = vmatpush3.bf16.msra.mxu1 %v2843_v45 }
 0x286   :  { %2332 = vmatprep.subr.bf16.mxu1 %v2494_v0 }
 0x289   :  { %2334 = vmatpush3.bf16.msra.mxu1 %v2847_v60 }
 0x28a   :  { %2335 = vmatprep.subr.bf16.mxu1 %v2494_v0 }
 0x28d   :  { %2337 = vmatpush3.bf16.msra.mxu1 %v2861_v34 }
 0x290   :  { %2048 = vmatmul.mubr.f32.vlgmr.msra.gmra.mrb[0].mxu1 %v2954_v6 }
 0x363   :  { %v1402_v47 = vpop.f32.mrb[0].mxu1 }
 0x364   :  { %v2339_v53 = vadd.f32 %v1425_v1, %v1402_v47  ;;  %v2049_v5 = vpop.f32.mrb[1].mxu1 }
 0x366   :  { %1406 = vst [vmem:[#allocation10] sm:$0xff] %v2339_v53 }
 0x367   :  { %2469 = shalt.err (!%p2466_p8)
}
 0x368   :  { %s2470_s27 = scalar_lea.hbm %s3080_s6, 128 }
 0x369   :  { %p2471_p9 = scmp.ne.s32.totalorder %s3080_s6, %s2470_s27  ;;  %p2474_p10 = scmp.lt.u32.totalorder %s2470_s27, %s3080_s6 }
 0x36b   :  { %p2476_p11 = pnand %p2474_p10, %p2471_p9 }
 0x36d   :  { %2479 = shalt.err (!%p2476_p11)
}
 0x36e   :  { %1416 = dma.vmem_to_hbm [thread:$0]  %s1414_s22, 128, %s3080_s6, [#allocation4]  }
 0x36f   :  { %2486 = dma.done.wait [#allocation4], 128  }
 0x370   :  { %2487 = vsyncadd [#allocation4], 4294967168 }
 0x371   :  { %1420 = vsyncpa [#allocation3], 1 }
 0x372   :  { %1421 = vsyncpa [#allocation6], 1 }
 0x373   :  { %1422 = vsyncpa [#allocation9], 1 }
 0x374   :  { %1423 = vsyncpa [#allocation4], 1 }

// kernel: tpu_custom_call.1
= control target key start
LH: loop header
LB: loop body
LE: loop exit
PB: predicated region body
PF: predicated region fallthrough
CT: control target
= control target key end

     0   :  { %11 = vsyncpa [#allocation3], 0  ;;  %s3074_s0 = inlined_call_operand.hbm [shape: f32[8,128], index: 0, kind: input, shape index: {}]   ;;  %s3075_s1 = inlined_call_operand.hbm [shape: f32[8,128], index: 1, kind: input, shape index: {}]   ;;  %s3076_s2 = inlined_call_operand.hbm [shape: f32[128,128], index: 2, kind: input, shape index: {}]   ;;  %s3077_s3 = inlined_call_operand.vmem [shape: f32[1,128], index: 3, kind: input, shape index: {}]   ;;  %s3078_s4 = inlined_call_operand.hbm [shape: f32[128,128], index: 4, kind: input, shape index: {}]   ;;  %s3079_s5 = inlined_call_operand.vmem [shape: f32[1,128], index: 5, kind: input, shape index: {}]   ;;  %s3080_s6 = inlined_call_operand.hbm [shape: f32[8,128], index: 6, kind: output, shape index: {}]  }
   0x1   :  { %12 = vsyncpa [#allocation6], 0 }
   0x2   :  { %13 = vsyncpa [#allocation9], 0 }
   0x3   :  { %14 = vsyncpa [#allocation4], 0  ;;  %s2488_s21 = smov [#allocation5]   ;;  %s2489_s23 = smov [#allocation2]  }
   0x4   :  { %s31_s22 = sshll.u32 %s2488_s21, 4  ;;  %s21_s24 = sshll.u32 %s2489_s23, 4  ;;  %s32_s22 = int_to_ptr.vmem [resolvable:$true] %s31_s22  ;;  %s22_s24 = int_to_ptr.vmem [resolvable:$true] %s21_s24 }
   0x5   :  { %s2370_s27 = scalar_lea.hbm %s3075_s1, 128 }
   0x6   :  { %p2371_p0 = scmp.ne.s32.totalorder %s3075_s1, %s2370_s27  ;;  %p2374_p1 = scmp.lt.u32.totalorder %s2370_s27, %s3075_s1 }
   0x8   :  { %p2376_p2 = pnand %p2374_p1, %p2371_p0 }
   0xa   :  { %2379 = shalt.err (!%p2376_p2)
}
   0xb   :  { %s2380_s8 = scalar_lea.vmem %s32_s22, 128  ;;  %p2385_p4 = scmp.lt.s32.totalorder %s32_s22, %s32_s22 }
   0xc   :  { %p2381_p3 = scmp.ne.s32.totalorder %s32_s22, %s2380_s8  ;;  %p2386_p5 = scmp.lt.s32.totalorder %s2380_s8, %s2380_s8 }
   0xe   :  { %p2387_p6 = por %p2386_p5, %p2385_p4 }
  0x10   :  { %p2388_p7 = pnand %p2387_p6, %p2381_p3 }
  0x12   :  { %2391 = shalt.err (!%p2388_p7)
}
  0x13   :  { %34 = dma.hbm_to_vmem [thread:$0]  %s3075_s1, 128, %s32_s22, [#allocation6]  }
  0x14   :  { %s2392_s13 = scalar_lea.hbm %s3074_s0, 128 }
  0x15   :  { %p2393_p8 = scmp.ne.s32.totalorder %s3074_s0, %s2392_s13  ;;  %p2396_p9 = scmp.lt.u32.totalorder %s2392_s13, %s3074_s0 }
  0x17   :  { %p2398_p10 = pnand %p2396_p9, %p2393_p8 }
  0x19   :  { %2401 = shalt.err (!%p2398_p10)
}
  0x1a   :  { %s2402_s18 = scalar_lea.vmem %s22_s24, 128  ;;  %p2407_p12 = scmp.lt.s32.totalorder %s22_s24, %s22_s24 }
  0x1b   :  { %p2403_p11 = scmp.ne.s32.totalorder %s22_s24, %s2402_s18  ;;  %p2408_p13 = scmp.lt.s32.totalorder %s2402_s18, %s2402_s18 }
  0x1d   :  { %p2409_p0 = por %p2408_p13, %p2407_p12 }
  0x1f   :  { %p2410_p1 = pnand %p2409_p0, %p2403_p11 }
  0x21   :  { %2413 = shalt.err (!%p2410_p1)
}
  0x22   :  { %24 = dma.hbm_to_vmem [thread:$0]  %s3074_s0, 128, %s22_s24, [#allocation3]  }
  0x23   :  { %s2490_s20 = smov [#allocation7]   ;;  %s2414_s25 = scalar_lea.hbm %s3076_s2, 2048 }
  0x24   :  { %s40_s21 = sshll.u32 %s2490_s20, 4  ;;  %p2415_p2 = scmp.ne.s32.totalorder %s3076_s2, %s2414_s25  ;;  %s41_s21 = int_to_ptr.vmem [resolvable:$true] %s40_s21 }
  0x25   :  { %p2418_p3 = scmp.lt.u32.totalorder %s2414_s25, %s3076_s2 }
  0x27   :  { %p2420_p4 = pnand %p2418_p3, %p2415_p2 }
  0x29   :  { %2423 = shalt.err (!%p2420_p4)
}
  0x2a   :  { %s2424_s30 = scalar_lea.vmem %s41_s21, 2048  ;;  %p2429_p6 = scmp.lt.s32.totalorder %s41_s21, %s41_s21 }
  0x2b   :  { %p2425_p5 = scmp.ne.s32.totalorder %s41_s21, %s2424_s30  ;;  %p2430_p7 = scmp.lt.s32.totalorder %s2424_s30, %s2424_s30 }
  0x2d   :  { %p2431_p8 = por %p2430_p7, %p2429_p6 }
  0x2f   :  { %p2432_p9 = pnand %p2431_p8, %p2425_p5 }
  0x31   :  { %2435 = shalt.err (!%p2432_p9)
}
  0x32   :  { %s2491_s0 = smov 128   ;;  %s2492_s24 = smov 8  }
  0x33   :  { %46 = dma.hbm_to_vmem [thread:$0]  %s3076_s2, 2048, %s41_s21, [#allocation6], %s2491_s0, %s2491_s0, %s2492_s24  }
  0x34   :  { %s2493_s9 = smov [#allocation8]   ;;  %s2436_s13 = scalar_lea.hbm %s3078_s4, 2048 }
  0x35   :  { %s54_s10 = sshll.u32 %s2493_s9, 4  ;;  %p2437_p10 = scmp.ne.s32.totalorder %s3078_s4, %s2436_s13  ;;  %s55_s10 = int_to_ptr.vmem [resolvable:$true] %s54_s10 }
  0x36   :  { %p2440_p11 = scmp.lt.u32.totalorder %s2436_s13, %s3078_s4 }
  0x38   :  { %p2442_p12 = pnand %p2440_p11, %p2437_p10 }
  0x3a   :  { %2445 = shalt.err (!%p2442_p12)
}
  0x3b   :  { %s2446_s18 = scalar_lea.vmem %s55_s10, 2048  ;;  %p2451_p0 = scmp.lt.s32.totalorder %s55_s10, %s55_s10 }
  0x3c   :  { %p2447_p13 = scmp.ne.s32.totalorder %s55_s10, %s2446_s18  ;;  %p2452_p1 = scmp.lt.s32.totalorder %s2446_s18, %s2446_s18 }
  0x3e   :  { %p2453_p2 = por %p2452_p1, %p2451_p0 }
  0x40   :  { %p2454_p3 = pnand %p2453_p2, %p2447_p13 }
  0x42   :  { %2457 = shalt.err (!%p2454_p3)
}
  0x43   :  { %60 = dma.hbm_to_vmem [thread:$0]  %s3078_s4, 2048, %s55_s10, [#allocation9], %s2491_s0, %s2491_s0, %s2492_s24  }
  0x44   :  { %2480 = dma.done.wait [#allocation3], 128  }
  0x45   :  { %2481 = vsyncadd [#allocation3], 4294967168 }
  0x46   :  { %2482 = dma.done.wait [#allocation6], 2176  }
  0x47   :  { %2483 = vsyncadd [#allocation6], 4294965120 }
  0x48   :  { %2484 = dma.done.wait [#allocation9], 2048  }
  0x49   :  { %2485 = vsyncadd [#allocation9], 4294965248  ;;  %v2494_v0 = vmov 0.0|0.0   ;;  %vm2495_vm0 = vmmov 0   ;;  %v2496_v1 = vmov 0.0   ;;  %v76_v2 = vld [vmem:[#allocation7] sm:$0xff] }
  0x4a   :  { %2050 = vmatprep.subr.bf16.mxu0 %v2494_v0  ;;  %1662 = vmatprep.mubr.msk.f32.mxu0 %vm2495_vm0, %v2496_v1  ;;  %v77_v3 = vld [vmem:[#allocation7 + $0x8] sm:$0xff]  ;;  %v78_v4 = vld [vmem:[#allocation7 + $0x10] sm:$0xff]  ;;  %v100_v5 = vand.u32 4294901760, %v76_v2  ;;  %v79_v7 = vld [vmem:[#allocation7 + $0x18] sm:$0xff]  ;;  %s2497_s21 = smov [#allocation10]  }
  0x4b   :  { %2194 = vmatprep.subr.bf16.mxu1 %v2494_v0  ;;  %1872 = vmatprep.mubr.msk.f32.mxu1 %vm2495_vm0, %v2496_v1  ;;  %v103_v6 = vand.u32 4294901760, %v77_v3  ;;  %v106_v8 = vand.u32 4294901760, %v78_v4  ;;  %v109_v9 = vand.u32 4294901760, %v79_v7  ;;  %v80_v10 = vld [vmem:[#allocation7 + $0x20] sm:$0xff]  ;;  %v81_v11 = vld [vmem:[#allocation7 + $0x28] sm:$0xff]  ;;  %v82_v16 = vld [vmem:[#allocation7 + $0x30] sm:$0xff] }
  0x4c   :  { %v112_v14 = vand.u32 4294901760, %v80_v10  ;;  %v115_v15 = vand.u32 4294901760, %v81_v11  ;;  %v83_v17 = vld [vmem:[#allocation7 + $0x38] sm:$0xff]  ;;  %v118_v19 = vand.u32 4294901760, %v82_v16  ;;  %v84_v21 = vld [vmem:[#allocation7 + $0x40] sm:$0xff]  ;;  %v85_v22 = vld [vmem:[#allocation7 + $0x48] sm:$0xff]  ;;  %v2597_v24 = vsub.f32 %v76_v2, %v100_v5 }
  0x4d   :  { %v2587_v12 = vpack.c.bf16 %v103_v6, %v100_v5  ;;  %v2590_v13 = vpack.c.bf16 %v109_v9, %v106_v8  ;;  %v121_v20 = vand.u32 4294901760, %v83_v17  ;;  %v75_v23 = vld [vmem:[#allocation5] sm:$0xff]  ;;  %v2599_v25 = vsub.f32 %v77_v3, %v103_v6  ;;  %v86_v29 = vld [vmem:[#allocation7 + $0x50] sm:$0xff]  ;;  %v88_v32 = vld [vmem:[#allocation7 + $0x60] sm:$0xff]  ;;  %s1413_s22 = sshll.u32 %s2497_s21, 4  ;;  %s1414_s22 = int_to_ptr.vmem [resolvable:$true] %s1413_s22 }
  0x4e   :  { %v2594_v18 = vpack.c.bf16 %v115_v15, %v112_v14  ;;  %v124_v27 = vand.u32 4294901760, %v84_v21  ;;  %v127_v28 = vand.u32 4294901760, %v85_v22  ;;  %v87_v30 = vld [vmem:[#allocation7 + $0x58] sm:$0xff]  ;;  %v2605_v31 = vand.u32 4294901760, %v75_v23  ;;  %v89_v35 = vld [vmem:[#allocation7 + $0x68] sm:$0xff]  ;;  %v90_v36 = vld [vmem:[#allocation7 + $0x70] sm:$0xff]  ;;  %p2463_p5 = scmp.lt.s32.totalorder %s1414_s22, %s1414_s22 }
  0x4f   :  { %2052 = vmatpush3.bf16.msra.mxu0 %v2587_v12  ;;  %v2602_v26 = vpack.c.bf16 %v121_v20, %v118_v19  ;;  %v2607_v33 = vsub.f32 %v78_v4, %v106_v8  ;;  %v130_v34 = vand.u32 4294901760, %v86_v29  ;;  %v91_v37 = vld [vmem:[#allocation7 + $0x78] sm:$0xff]  ;;  %v133_v39 = vand.u32 4294901760, %v87_v30  ;;  %s2458_s23 = scalar_lea.vmem %s1414_s22, 128 }
  0x50   :  { %2053 = vmatprep.subr.bf16.mxu0 %v2494_v0  ;;  %v2610_v38 = vpack.c.bf16 %v127_v28, %v124_v27  ;;  %v193_v40 = vand.u32 4294901760, %v2597_v24  ;;  %v200_v41 = vand.u32 4294901760, %v2599_v25  ;;  %v2614_v42 = vsub.f32 %v79_v7, %v109_v9  ;;  %p2459_p4 = scmp.ne.s32.totalorder %s1414_s22, %s2458_s23  ;;  %p2464_p6 = scmp.lt.s32.totalorder %s2458_s23, %s2458_s23 }
  0x51   :  { %v2616_v43 = vsub.f32 %v80_v10, %v112_v14  ;;  %v2618_v44 = vsub.f32 %v81_v11, %v115_v15  ;;  %v2622_v45 = vsub.f32 %v75_v23, %v2605_v31  ;;  %v136_v46 = vand.u32 4294901760, %v88_v32 }
  0x52   :  { %v139_v47 = vand.u32 4294901760, %v89_v35  ;;  %v142_v48 = vand.u32 4294901760, %v90_v36  ;;  %v145_v49 = vand.u32 4294901760, %v91_v37  ;;  %v2624_v50 = vsub.f32 %v82_v16, %v118_v19  ;;  %p2465_p7 = por %p2464_p6, %p2463_p5 }
  0x53   :  { %2055 = vmatpush3.bf16.msra.mxu0 %v2590_v13  ;;  %v2626_v51 = vsub.f32 %v83_v17, %v121_v20  ;;  %v2628_v52 = vsub.f32 %v84_v21, %v124_v27  ;;  %v207_v53 = vand.u32 4294901760, %v2607_v33  ;;  %v2632_v54 = vsub.f32 %v85_v22, %v127_v28 }
  0x54   :  { %2056 = vmatprep.subr.bf16.mxu0 %v2494_v0  ;;  %v2634_v55 = vpack.c.bf16 %v133_v39, %v130_v34  ;;  %v194_v56 = vsub.f32 %v2597_v24, %v193_v40  ;;  %v201_v57 = vsub.f32 %v2599_v25, %v200_v41  ;;  %v2639_v58 = vsub.f32 %v86_v29, %v130_v34  ;;  %p2466_p8 = pnand %p2465_p7, %p2459_p4 }
  0x55   :  { %v2641_v59 = vsub.f32 %v87_v30, %v133_v39  ;;  %v2643_v60 = vsub.f32 %v88_v32, %v136_v46  ;;  %v182_v61 = vand.u32 4294901760, %v2622_v45  ;;  %v2646_v62 = vpack.c.bf16 %v139_v47, %v136_v46 }
  0x56   :  { %v2648_v63 = vsub.f32 %v89_v35, %v139_v47  ;;  %v2650_v2 = vpack.c.bf16 %v145_v49, %v142_v48  ;;  %v2652_v3 = vsub.f32 %v90_v36, %v142_v48  ;;  %v2654_v4 = vsub.f32 %v91_v37, %v145_v49 }
  0x57   :  { %2058 = vmatpush3.bf16.msra.mxu0 %v2594_v18  ;;  %v208_v5 = vsub.f32 %v2607_v33, %v207_v53  ;;  %v214_v6 = vand.u32 4294901760, %v2614_v42  ;;  %v221_v7 = vand.u32 4294901760, %v2616_v43  ;;  %v195_v8 = vand.u32 4294901760, %v194_v56 }
  0x58   :  { %2059 = vmatprep.subr.bf16.mxu0 %v2494_v0  ;;  %v202_v9 = vand.u32 4294901760, %v201_v57  ;;  %v228_v10 = vand.u32 4294901760, %v2618_v44  ;;  %v235_v11 = vand.u32 4294901760, %v2624_v50  ;;  %v183_v14 = vsub.f32 %v2622_v45, %v182_v61 }
  0x59   :  { %v242_v15 = vand.u32 4294901760, %v2626_v51  ;;  %v249_v16 = vand.u32 4294901760, %v2628_v52  ;;  %v256_v17 = vand.u32 4294901760, %v2632_v54  ;;  %v263_v19 = vand.u32 4294901760, %v2639_v58 }
  0x5a   :  { %v270_v20 = vand.u32 4294901760, %v2641_v59  ;;  %v277_v21 = vand.u32 4294901760, %v2643_v60  ;;  %v284_v22 = vand.u32 4294901760, %v2648_v63  ;;  %v291_v23 = vand.u32 4294901760, %v2652_v3 }
  0x5b   :  { %2061 = vmatpush3.bf16.msra.mxu0 %v2602_v26  ;;  %v298_v27 = vand.u32 4294901760, %v2654_v4  ;;  %v2675_v28 = vpack.c.bf16 %v200_v41, %v193_v40  ;;  %v2677_v29 = vpack.c.bf16 %v214_v6, %v207_v53  ;;  %v215_v30 = vsub.f32 %v2614_v42, %v214_v6 }
  0x5c   :  { %2062 = vmatprep.subr.bf16.mxu0 %v2494_v0  ;;  %v2681_v32 = vpack.c.bf16 %v228_v10, %v221_v7  ;;  %v2683_v34 = vpack.c.bf16 %v242_v15, %v235_v11  ;;  %v2685_v35 = vpack.c.bf16 %v256_v17, %v249_v16  ;;  %v2688_v36 = vpack.c.bf16 %v270_v20, %v263_v19 }
  0x5d   :  { %v2690_v37 = vpack.c.bf16 %v284_v22, %v277_v21  ;;  %v2692_v39 = vpack.c.bf16 %v298_v27, %v291_v23  ;;  %v184_v40 = vand.u32 4294901760, %v183_v14  ;;  %v209_v41 = vand.u32 4294901760, %v208_v5 }
  0x5e   :  { %v2075_v46 = vpack.c.bf16 %v202_v9, %v195_v8  ;;  %v216_v47 = vand.u32 4294901760, %v215_v30  ;;  %v222_v48 = vsub.f32 %v2616_v43, %v221_v7  ;;  %v229_v49 = vsub.f32 %v2618_v44, %v228_v10 }
  0x5f   :  { %2064 = vmatpush3.bf16.msra.mxu0 %v2610_v38  ;;  %v236_v53 = vsub.f32 %v2624_v50, %v235_v11  ;;  %v243_v14 = vsub.f32 %v2626_v51, %v242_v15  ;;  %v250_v5 = vsub.f32 %v2628_v52, %v249_v16  ;;  %v257_v10 = vsub.f32 %v2632_v54, %v256_v17 }
  0x60   :  { %2065 = vmatprep.subr.bf16.mxu0 %v2494_v0  ;;  %v2078_v56 = vpack.c.bf16 %v216_v47, %v209_v41  ;;  %v223_v57 = vand.u32 4294901760, %v222_v48  ;;  %v230_v6 = vand.u32 4294901760, %v229_v49  ;;  %v264_v15 = vsub.f32 %v2639_v58, %v263_v19 }
  0x61   :  { %v237_v8 = vand.u32 4294901760, %v236_v53  ;;  %v244_v9 = vand.u32 4294901760, %v243_v14  ;;  %v251_v11 = vand.u32 4294901760, %v250_v5  ;;  %v271_v41 = vsub.f32 %v2641_v59, %v270_v20  ;;  %v744_v5 = vld [vmem:[#allocation8 + $0x10] sm:$0xff] }
  0x62   :  { %v2081_v7 = vpack.c.bf16 %v230_v6, %v223_v57  ;;  %v278_v16 = vsub.f32 %v2643_v60, %v277_v21  ;;  %v265_v47 = vand.u32 4294901760, %v264_v15  ;;  %v285_v17 = vsub.f32 %v2648_v63, %v284_v22 }
  0x63   :  { %2067 = vmatpush3.bf16.msra.mxu0 %v2634_v55  ;;  %v2084_v30 = vpack.c.bf16 %v244_v9, %v237_v8  ;;  %v272_v48 = vand.u32 4294901760, %v271_v41  ;;  %v292_v19 = vsub.f32 %v2652_v3, %v291_v23  ;;  %v299_v20 = vsub.f32 %v2654_v4, %v298_v27  ;;  %v742_v23 = vld [vmem:[#allocation8] sm:$0xff]  ;;  %v743_v27 = vld [vmem:[#allocation8 + $0x8] sm:$0xff]  ;;  %v748_v41 = vld [vmem:[#allocation8 + $0x30] sm:$0xff] }
  0x64   :  { %2068 = vmatprep.subr.bf16.mxu0 %v2494_v0  ;;  %v279_v49 = vand.u32 4294901760, %v278_v16  ;;  %v2099_v14 = vpack.c.bf16 %v2599_v25, %v2597_v24  ;;  %v766_v8 = vand.u32 4294901760, %v742_v23  ;;  %v769_v9 = vand.u32 4294901760, %v743_v27  ;;  %v747_v24 = vld [vmem:[#allocation8 + $0x28] sm:$0xff]  ;;  %v749_v16 = vld [vmem:[#allocation8 + $0x38] sm:$0xff] }
  0x65   :  { %v2090_v53 = vpack.c.bf16 %v272_v48, %v265_v47  ;;  %v293_v57 = vand.u32 4294901760, %v292_v19  ;;  %v300_v6 = vand.u32 4294901760, %v299_v20  ;;  %v781_v15 = vand.u32 4294901760, %v747_v24 }
  0x66   :  { %v2726_v47 = vpack.c.bf16 %v769_v9, %v766_v8 }
  0x67   :  { %2070 = vmatpush3.bf16.msra.mxu0 %v2646_v62  ;;  %v2096_v22 = vpack.c.bf16 %v300_v6, %v293_v57  ;;  %v2743_v20 = vsub.f32 %v747_v24, %v781_v15  ;;  %v787_v57 = vand.u32 4294901760, %v749_v16 }
  0x68   :  { %2071 = vmatprep.subr.bf16.mxu0 %v2494_v0  ;;  %2196 = vmatpush3.bf16.msra.mxu1 %v2726_v47 }
  0x69   :  { %2197 = vmatprep.subr.bf16.mxu1 %v2494_v0 }
  0x6b   :  { %2073 = vmatpush3.bf16.msra.mxu0 %v2650_v2 }
  0x6c   :  { %2074 = vmatprep.subr.bf16.mxu0 %v2494_v0 }
  0x6e   :  { %1663 = vmatmul.mubr.f32.vlgmr.msra.gmra.mrb[0].mxu0 %v184_v40  ;;  %v258_v40 = vand.u32 4294901760, %v257_v10  ;;  %v745_v10 = vld [vmem:[#allocation8 + $0x18] sm:$0xff] }
  0x6f   :  { %2076 = vmatpush3.bf16.msra.mxu0 %v2075_v46  ;;  %1697 = vmatprep.mubr.msk.f32.mxu0 %vm2495_vm0, %v2496_v1  ;;  %v775_v25 = vand.u32 4294901760, %v745_v10 }
  0x70   :  { %2077 = vmatprep.subr.bf16.mxu0 %v2494_v0  ;;  %v2087_v46 = vpack.c.bf16 %v258_v40, %v251_v11  ;;  %v772_v11 = vand.u32 4294901760, %v744_v5 }
  0x72   :  { %v2732_v48 = vsub.f32 %v744_v5, %v772_v11 }
  0x73   :  { %2079 = vmatpush3.bf16.msra.mxu0 %v2078_v56  ;;  %v286_v56 = vand.u32 4294901760, %v285_v17  ;;  %v751_v17 = vld [vmem:[#allocation8 + $0x48] sm:$0xff] }
  0x74   :  { %2080 = vmatprep.subr.bf16.mxu0 %v2494_v0 }
  0x75   :  { %v2093_v21 = vpack.c.bf16 %v286_v56, %v279_v49  ;;  %v2105_v49 = vpack.c.bf16 %v2618_v44, %v2616_v43  ;;  %v2738_v56 = vsub.f32 %v745_v10, %v775_v25  ;;  %v2749_v44 = vsub.f32 %v749_v16, %v787_v57 }
  0x76   :  { %v873_v10 = vand.u32 4294901760, %v2732_v48 }
  0x77   :  { %2082 = vmatpush3.bf16.msra.mxu0 %v2081_v7  ;;  %v2102_v7 = vpack.c.bf16 %v2614_v42, %v2607_v33  ;;  %v2728_v33 = vsub.f32 %v742_v23, %v766_v8  ;;  %v2730_v42 = vsub.f32 %v743_v27, %v769_v9  ;;  %v2108_v27 = vpack.c.bf16 %v2626_v51, %v2624_v50 }
  0x78   :  { %2083 = vmatprep.subr.bf16.mxu0 %v2494_v0  ;;  %v2114_v50 = vpack.c.bf16 %v2641_v59, %v2639_v58  ;;  %v755_v58 = vld [vmem:[#allocation8 + $0x68] sm:$0xff]  ;;  %v874_v24 = vsub.f32 %v2732_v48, %v873_v10 }
  0x79   :  { %v805_v59 = vand.u32 4294901760, %v755_v58 }
  0x7b   :  { %2085 = vmatpush3.bf16.msra.mxu0 %v2084_v30  ;;  %v746_v30 = vld [vmem:[#allocation8 + $0x20] sm:$0xff] }
  0x7c   :  { %2086 = vmatprep.subr.bf16.mxu0 %v2494_v0  ;;  %v778_v40 = vand.u32 4294901760, %v746_v30 }
  0x7e   :  { %v2740_v19 = vsub.f32 %v746_v30, %v778_v40  ;;  %v2758_v5 = vpack.c.bf16 %v781_v15, %v778_v40  ;;  %v875_v15 = vand.u32 4294901760, %v874_v24 }
  0x7f   :  { %2088 = vmatpush3.bf16.msra.mxu0 %v2087_v46  ;;  %v750_v46 = vld [vmem:[#allocation8 + $0x40] sm:$0xff] }
  0x80   :  { %2089 = vmatprep.subr.bf16.mxu0 %v2494_v0  ;;  %v790_v6 = vand.u32 4294901760, %v750_v46  ;;  %v887_v16 = vand.u32 4294901760, %v2740_v19 }
  0x83   :  { %2091 = vmatpush3.bf16.msra.mxu0 %v2090_v53  ;;  %v2736_v53 = vpack.c.bf16 %v775_v25, %v772_v11  ;;  %v880_v11 = vand.u32 4294901760, %v2738_v56 }
  0x84   :  { %2092 = vmatprep.subr.bf16.mxu0 %v2494_v0 }
  0x85   :  { %2199 = vmatpush3.bf16.msra.mxu1 %v2736_v53  ;;  %v881_v25 = vsub.f32 %v2738_v56, %v880_v11 }
  0x86   :  { %2200 = vmatprep.subr.bf16.mxu1 %v2494_v0 }
  0x87   :  { %2094 = vmatpush3.bf16.msra.mxu0 %v2093_v21  ;;  %v784_v21 = vand.u32 4294901760, %v748_v41 }
  0x88   :  { %2095 = vmatprep.subr.bf16.mxu0 %v2494_v0 }
  0x89   :  { %v2747_v43 = vsub.f32 %v748_v41, %v784_v21  ;;  %2202 = vmatpush3.bf16.msra.mxu1 %v2758_v5  ;;  %v2765_v8 = vpack.c.bf16 %v787_v57, %v784_v21  ;;  %v882_v41 = vand.u32 4294901760, %v881_v25 }
  0x8a   :  { %2203 = vmatprep.subr.bf16.mxu1 %v2494_v0 }
  0x8b   :  { %2097 = vmatpush3.bf16.msra.mxu0 %v2096_v22  ;;  %v793_v22 = vand.u32 4294901760, %v751_v17 }
  0x8c   :  { %2098 = vmatprep.subr.bf16.mxu0 %v2494_v0 }
  0x8d   :  { %v2753_v23 = vsub.f32 %v751_v17, %v793_v22  ;;  %2205 = vmatpush3.bf16.msra.mxu1 %v2765_v8  ;;  %v2772_v51 = vpack.c.bf16 %v793_v22, %v790_v6  ;;  %v2887_v17 = vpack.c.bf16 %v882_v41, %v875_v15  ;;  %v901_v22 = vand.u32 4294901760, %v2747_v43 }
  0x8e   :  { %1698 = vmatmul.mubr.f32.vlgmr.msra.gmra.mrb[0].mxu0 %v2605_v31  ;;  %2206 = vmatprep.subr.bf16.mxu1 %v2494_v0 }
  0x8f   :  { %2100 = vmatpush3.bf16.msra.mxu0 %v2099_v14  ;;  %1732 = vmatprep.mubr.msk.f32.mxu0 %vm2495_vm0, %v2496_v1  ;;  %v2751_v14 = vsub.f32 %v750_v46, %v790_v6  ;;  %v894_v46 = vand.u32 4294901760, %v2743_v20 }
  0x90   :  { %2101 = vmatprep.subr.bf16.mxu0 %v2494_v0 }
  0x91   :  { %2208 = vmatpush3.bf16.msra.mxu1 %v2772_v51  ;;  %v895_v21 = vsub.f32 %v2743_v20, %v894_v46 }
  0x92   :  { %2209 = vmatprep.subr.bf16.mxu1 %v2494_v0 }
  0x93   :  { %2103 = vmatpush3.bf16.msra.mxu0 %v2102_v7  ;;  %v2111_v7 = vpack.c.bf16 %v2632_v54, %v2628_v52  ;;  %v2117_v52 = vpack.c.bf16 %v2648_v63, %v2643_v60  ;;  %v2120_v54 = vpack.c.bf16 %v2654_v4, %v2652_v3  ;;  %v2856_v3 = vsub.f32 %v755_v58, %v805_v59 }
  0x94   :  { %2104 = vmatprep.subr.bf16.mxu0 %v2494_v0  ;;  %v896_v6 = vand.u32 4294901760, %v895_v21 }
  0x95   :  { %v3083_v24 = vand.u32 4294901760, %v2856_v3 }
  0x97   :  { %2106 = vmatpush3.bf16.msra.mxu0 %v2105_v49  ;;  %v888_v49 = vsub.f32 %v2740_v19, %v887_v16  ;;  %v951_v41 = vsub.f32 %v2856_v3, %v3083_v24 }
  0x98   :  { %2107 = vmatprep.subr.bf16.mxu0 %v2494_v0 }
  0x99   :  { %v889_v57 = vand.u32 4294901760, %v888_v49  ;;  %v952_v21 = vand.u32 4294901760, %v951_v41 }
  0x9b   :  { %2109 = vmatpush3.bf16.msra.mxu0 %v2108_v27  ;;  %v908_v27 = vand.u32 4294901760, %v2749_v44 }
  0x9c   :  { %2110 = vmatprep.subr.bf16.mxu0 %v2494_v0 }
  0x9f   :  { %2112 = vmatpush3.bf16.msra.mxu0 %v2111_v7  ;;  %v2225_v7 = vpack.c.bf16 %v896_v6, %v889_v57 }
  0xa0   :  { %2113 = vmatprep.subr.bf16.mxu0 %v2494_v0 }
  0xa3   :  { %2115 = vmatpush3.bf16.msra.mxu0 %v2114_v50  ;;  %v902_v50 = vsub.f32 %v2747_v43, %v901_v22 }
  0xa4   :  { %2116 = vmatprep.subr.bf16.mxu0 %v2494_v0 }
  0xa7   :  { %2118 = vmatpush3.bf16.msra.mxu0 %v2117_v52  ;;  %v909_v52 = vsub.f32 %v2749_v44, %v908_v27 }
  0xa8   :  { %2119 = vmatprep.subr.bf16.mxu0 %v2494_v0 }
  0xab   :  { %2121 = vmatpush3.bf16.msra.mxu0 %v2120_v54  ;;  %v903_v54 = vand.u32 4294901760, %v902_v50 }
  0xac   :  { %2122 = vmatprep.subr.bf16.mxu0 %v2494_v0 }
  0xae   :  { %1733 = vmatmul.mubr.f32.vlgmr.msra.gmra.mrb[0].mxu0 %v2622_v45 }
  0xaf   :  { %2124 = vmatpush3.bf16.msra.mxu0 %v2587_v12  ;;  %1767 = vmatprep.mubr.msk.f32.mxu0 %vm2495_vm0, %v2496_v1 }
  0xb0   :  { %2125 = vmatprep.subr.bf16.mxu0 %v2494_v0 }
  0xb3   :  { %2127 = vmatpush3.bf16.msra.mxu0 %v2590_v13 }
  0xb4   :  { %2128 = vmatprep.subr.bf16.mxu0 %v2494_v0 }
  0xb7   :  { %2130 = vmatpush3.bf16.msra.mxu0 %v2594_v18 }
  0xb8   :  { %2131 = vmatprep.subr.bf16.mxu0 %v2494_v0 }
  0xbb   :  { %2133 = vmatpush3.bf16.msra.mxu0 %v2602_v26 }
  0xbc   :  { %2134 = vmatprep.subr.bf16.mxu0 %v2494_v0 }
  0xbf   :  { %2136 = vmatpush3.bf16.msra.mxu0 %v2610_v38 }
  0xc0   :  { %2137 = vmatprep.subr.bf16.mxu0 %v2494_v0 }
  0xc3   :  { %2139 = vmatpush3.bf16.msra.mxu0 %v2634_v55 }
  0xc4   :  { %2140 = vmatprep.subr.bf16.mxu0 %v2494_v0 }
  0xc7   :  { %2142 = vmatpush3.bf16.msra.mxu0 %v2646_v62 }
  0xc8   :  { %2143 = vmatprep.subr.bf16.mxu0 %v2494_v0 }
  0xcb   :  { %2145 = vmatpush3.bf16.msra.mxu0 %v2650_v2 }
  0xcc   :  { %2146 = vmatprep.subr.bf16.mxu0 %v2494_v0 }
  0xce   :  { %1768 = vmatmul.mubr.f32.vlgmr.msra.gmra.mrb[0].mxu0 %v182_v61  ;;  %v756_v61 = vld [vmem:[#allocation8 + $0x70] sm:$0xff] }
  0xcf   :  { %2148 = vmatpush3.bf16.msra.mxu0 %v2675_v28  ;;  %1802 = vmatprep.mubr.msk.f32.mxu0 %vm2495_vm0, %v2496_v1  ;;  %v808_v4 = vand.u32 4294901760, %v756_v61 }
  0xd0   :  { %2149 = vmatprep.subr.bf16.mxu0 %v2494_v0 }
  0xd3   :  { %2151 = vmatpush3.bf16.msra.mxu0 %v2677_v29  ;;  %v859_v29 = vand.u32 4294901760, %v2728_v33 }
  0xd4   :  { %2152 = vmatprep.subr.bf16.mxu0 %v2494_v0 }
  0xd7   :  { %2154 = vmatpush3.bf16.msra.mxu0 %v2681_v32  ;;  %v866_v32 = vand.u32 4294901760, %v2730_v42 }
  0xd8   :  { %2155 = vmatprep.subr.bf16.mxu0 %v2494_v0 }
  0xdb   :  { %2157 = vmatpush3.bf16.msra.mxu0 %v2683_v34 }
  0xdc   :  { %2158 = vmatprep.subr.bf16.mxu0 %v2494_v0 }
  0xdf   :  { %2160 = vmatpush3.bf16.msra.mxu0 %v2685_v35  ;;  %v2863_v35 = vsub.f32 %v756_v61, %v808_v4 }
  0xe0   :  { %2161 = vmatprep.subr.bf16.mxu0 %v2494_v0 }
  0xe1   :  { %v3082_v57 = vand.u32 4294901760, %v2863_v35 }
  0xe3   :  { %2163 = vmatpush3.bf16.msra.mxu0 %v2688_v36 }
  0xe4   :  { %2164 = vmatprep.subr.bf16.mxu0 %v2494_v0 }
  0xe7   :  { %2166 = vmatpush3.bf16.msra.mxu0 %v2690_v37  ;;  %v860_v37 = vsub.f32 %v2728_v33, %v859_v29 }
  0xe8   :  { %2167 = vmatprep.subr.bf16.mxu0 %v2494_v0 }
  0xe9   :  { %v861_v9 = vand.u32 4294901760, %v860_v37 }
  0xeb   :  { %2169 = vmatpush3.bf16.msra.mxu0 %v2692_v39  ;;  %v867_v39 = vsub.f32 %v2730_v42, %v866_v32 }
  0xec   :  { %2170 = vmatprep.subr.bf16.mxu0 %v2494_v0 }
  0xed   :  { %v868_v30 = vand.u32 4294901760, %v867_v39 }
  0xee   :  { %1803 = vmatmul.mubr.f32.vlgmr.msra.gmra.mrb[0].mxu0 %v2605_v31 }
  0xef   :  { %2172 = vmatpush3.bf16.msra.mxu0 %v2587_v12  ;;  %1837 = vmatprep.mubr.msk.f32.mxu0 %vm2495_vm0, %v2496_v1  ;;  %v752_v12 = vld [vmem:[#allocation8 + $0x50] sm:$0xff]  ;;  %v2883_v40 = vpack.c.bf16 %v868_v30, %v861_v9 }
  0xf0   :  { %2173 = vmatprep.subr.bf16.mxu0 %v2494_v0 }
  0xf3   :  { %2175 = vmatpush3.bf16.msra.mxu0 %v2590_v13  ;;  %v753_v13 = vld [vmem:[#allocation8 + $0x58] sm:$0xff] }
  0xf4   :  { %2176 = vmatprep.subr.bf16.mxu0 %v2494_v0 }
  0xf7   :  { %2178 = vmatpush3.bf16.msra.mxu0 %v2594_v18  ;;  %v796_v18 = vand.u32 4294901760, %v752_v12 }
  0xf8   :  { %2179 = vmatprep.subr.bf16.mxu0 %v2494_v0 }
  0xf9   :  { %v2849_v63 = vsub.f32 %v752_v12, %v796_v18  ;;  %v910_v12 = vand.u32 4294901760, %v909_v52  ;;  %v958_v52 = vsub.f32 %v2863_v35, %v3082_v57 }
  0xfb   :  { %2181 = vmatpush3.bf16.msra.mxu0 %v2602_v26  ;;  %v799_v26 = vand.u32 4294901760, %v753_v13  ;;  %v929_v61 = vand.u32 4294901760, %v2849_v63 }
  0xfc   :  { %2182 = vmatprep.subr.bf16.mxu0 %v2494_v0 }
  0xfd   :  { %v2843_v45 = vpack.c.bf16 %v799_v26, %v796_v18  ;;  %v922_v18 = vand.u32 4294901760, %v2753_v23 }
  0xff   :  { %2184 = vmatpush3.bf16.msra.mxu0 %v2610_v38  ;;  %v754_v38 = vld [vmem:[#allocation8 + $0x60] sm:$0xff]  ;;  %2211 = vmatpush3.bf16.msra.mxu1 %v2843_v45  ;;  %v923_v58 = vsub.f32 %v2753_v23, %v922_v18 }
 0x100   :  { %2185 = vmatprep.subr.bf16.mxu0 %v2494_v0  ;;  %2212 = vmatprep.subr.bf16.mxu1 %v2494_v0 }
 0x103   :  { %2187 = vmatpush3.bf16.msra.mxu0 %v2634_v55  ;;  %v802_v55 = vand.u32 4294901760, %v754_v38 }
 0x104   :  { %2188 = vmatprep.subr.bf16.mxu0 %v2494_v0 }
 0x105   :  { %v2847_v60 = vpack.c.bf16 %v805_v59, %v802_v55  ;;  %v924_v59 = vand.u32 4294901760, %v923_v58 }
 0x107   :  { %2190 = vmatpush3.bf16.msra.mxu0 %v2646_v62  ;;  %v757_v62 = vld [vmem:[#allocation8 + $0x78] sm:$0xff]  ;;  %2214 = vmatpush3.bf16.msra.mxu1 %v2847_v60 }
 0x108   :  { %2191 = vmatprep.subr.bf16.mxu0 %v2494_v0  ;;  %2215 = vmatprep.subr.bf16.mxu1 %v2494_v0  ;;  %v811_v28 = vand.u32 4294901760, %v757_v62 }
 0x10a   :  { %v2861_v34 = vpack.c.bf16 %v811_v28, %v808_v4  ;;  %v2865_v36 = vsub.f32 %v757_v62, %v811_v28  ;;  %v930_v28 = vsub.f32 %v2849_v63, %v929_v61 }
 0x10b   :  { %2193 = vmatpush3.bf16.msra.mxu0 %v2650_v2  ;;  %v2854_v2 = vsub.f32 %v754_v38, %v802_v55 }
 0x10c   :  { %2217 = vmatpush3.bf16.msra.mxu1 %v2861_v34  ;;  %v931_v39 = vand.u32 4294901760, %v930_v28  ;;  %v3081_v6 = vand.u32 4294901760, %v2865_v36  ;;  %v2249_v28 = vpack.c.bf16 %v2743_v20, %v2740_v19  ;;  %v2264_v41 = vpack.c.bf16 %v2865_v36, %v2863_v35 }
 0x10d   :  { %2218 = vmatprep.subr.bf16.mxu1 %v2494_v0  ;;  %v3084_v30 = vand.u32 4294901760, %v2854_v2  ;;  %v3087_v20 = vand.u32 4294901760, %v2854_v2 }
 0x10e   :  { %1838 = vmatmul.mubr.f32.vlgmr.msra.gmra.mrb[0].mxu0 %v2605_v31  ;;  %v2851_v31 = vsub.f32 %v753_v13, %v799_v26  ;;  %v915_v13 = vand.u32 4294901760, %v2751_v14  ;;  %v2228_v26 = vpack.c.bf16 %v910_v12, %v903_v54  ;;  %v965_v54 = vsub.f32 %v2865_v36, %v3081_v6 }
 0x10f   :  { %v944_v15 = vsub.f32 %v2854_v2, %v3084_v30  ;;  %v959_v12 = vand.u32 4294901760, %v958_v52  ;;  %v740_v52 = vld [vmem:[#allocation2] sm:$0xff] }
 0x110   :  { %v916_v38 = vsub.f32 %v2751_v14, %v915_v13  ;;  %v3085_v62 = vand.u32 4294901760, %v2851_v31 }
 0x111   :  { %v945_v49 = vand.u32 4294901760, %v944_v15  ;;  %v2261_v15 = vpack.c.bf16 %v2856_v3, %v2854_v2 }
 0x112   :  { %v917_v55 = vand.u32 4294901760, %v916_v38  ;;  %v937_v37 = vsub.f32 %v2851_v31, %v3085_v62  ;;  %v966_v38 = vand.u32 4294901760, %v965_v54 }
 0x113   :  { %v2237_v50 = vpack.c.bf16 %v952_v21, %v945_v49  ;;  %v1424_v49 = vld [vmem:[%s3077_s3] ss:$0 sm:$0xff] }
 0x114   :  { %v2231_v4 = vpack.c.bf16 %v924_v59, %v917_v55  ;;  %v938_v9 = vand.u32 4294901760, %v937_v37  ;;  %v2240_v58 = vpack.c.bf16 %v966_v38, %v959_v12  ;;  %v2243_v55 = vpack.c.bf16 %v2730_v42, %v2728_v33 }
 0x115   :  { %v2246_v59 = vpack.c.bf16 %v2738_v56, %v2732_v48  ;;  %v2252_v37 = vpack.c.bf16 %v2749_v44, %v2747_v43  ;;  %v2297_v33 = vpack.c.bf16 %v894_v46, %v887_v16  ;;  %v2300_v42 = vpack.c.bf16 %v908_v27, %v901_v22 }
 0x116   :  { %v2234_v25 = vpack.c.bf16 %v938_v9, %v931_v39  ;;  %v2255_v39 = vpack.c.bf16 %v2753_v23, %v2751_v14  ;;  %v2258_v9 = vpack.c.bf16 %v2851_v31, %v2849_v63  ;;  %v2303_v48 = vpack.c.bf16 %v922_v18, %v915_v13 }
 0x117   :  { %v3086_v56 = vand.u32 4294901760, %v2851_v31  ;;  %v3088_v43 = vand.u32 4294901760, %v2856_v3  ;;  %v3089_v14 = vand.u32 4294901760, %v2863_v35  ;;  %v3090_v23 = vand.u32 4294901760, %v2865_v36 }
 0x119   :  { %v2306_v19 = vpack.c.bf16 %v3086_v56, %v929_v61  ;;  %v2309_v44 = vpack.c.bf16 %v3088_v43, %v3087_v20 }
 0x1e1   :  { %v736_v21 = vpop.f32.mrb[0].mxu0 }
 0x1e2   :  { %v2338_v54 = vadd.f32 %v1424_v49, %v736_v21  ;;  %v1839_v12 = vpop.f32.mrb[1].mxu0 }
 0x1e4   :  { %v741_v38 = vmul.f32 %v2338_v54, %v740_v52 }
 0x1e6   :  { %v2954_v6 = vand.u32 4294901760, %v741_v38 }
 0x1e8   :  { %v847_v57 = vsub.f32 %v741_v38, %v2954_v6 }
 0x1ea   :  { %v848_v24 = vand.u32 4294901760, %v847_v57 }
 0x1ec   :  { %v849_v30 = vsub.f32 %v847_v57, %v848_v24 }
 0x1ee   :  { %v850_v62 = vand.u32 4294901760, %v849_v30 }
 0x1f0   :  { %1873 = vmatmul.mubr.f32.vlgmr.msra.gmra.mrb[0].mxu1 %v850_v62 }
 0x1f1   :  { %2220 = vmatpush3.bf16.msra.mxu1 %v2883_v40  ;;  %1907 = vmatprep.mubr.msk.f32.mxu1 %vm2495_vm0, %v2496_v1  ;;  %v2291_v40 = vpack.c.bf16 %v866_v32, %v859_v29  ;;  %v2312_v29 = vpack.c.bf16 %v3090_v23, %v3089_v14 }
 0x1f2   :  { %2221 = vmatprep.subr.bf16.mxu1 %v2494_v0 }
 0x1f5   :  { %2223 = vmatpush3.bf16.msra.mxu1 %v2887_v17  ;;  %v2294_v17 = vpack.c.bf16 %v880_v11, %v873_v10 }
 0x1f6   :  { %2224 = vmatprep.subr.bf16.mxu1 %v2494_v0 }
 0x1f9   :  { %2226 = vmatpush3.bf16.msra.mxu1 %v2225_v7 }
 0x1fa   :  { %2227 = vmatprep.subr.bf16.mxu1 %v2494_v0 }
 0x1fd   :  { %2229 = vmatpush3.bf16.msra.mxu1 %v2228_v26 }
 0x1fe   :  { %2230 = vmatprep.subr.bf16.mxu1 %v2494_v0 }
 0x201   :  { %2232 = vmatpush3.bf16.msra.mxu1 %v2231_v4 }
 0x202   :  { %2233 = vmatprep.subr.bf16.mxu1 %v2494_v0 }
 0x205   :  { %2235 = vmatpush3.bf16.msra.mxu1 %v2234_v25 }
 0x206   :  { %2236 = vmatprep.subr.bf16.mxu1 %v2494_v0 }
 0x209   :  { %2238 = vmatpush3.bf16.msra.mxu1 %v2237_v50 }
 0x20a   :  { %2239 = vmatprep.subr.bf16.mxu1 %v2494_v0 }
 0x20d   :  { %2241 = vmatpush3.bf16.msra.mxu1 %v2240_v58 }
 0x20e   :  { %2242 = vmatprep.subr.bf16.mxu1 %v2494_v0 }
 0x210   :  { %1908 = vmatmul.mubr.f32.vlgmr.msra.gmra.mrb[0].mxu1 %v2954_v6 }
 0x211   :  { %2244 = vmatpush3.bf16.msra.mxu1 %v2243_v55  ;;  %1942 = vmatprep.mubr.msk.f32.mxu1 %vm2495_vm0, %v2496_v1 }
 0x212   :  { %2245 = vmatprep.subr.bf16.mxu1 %v2494_v0 }
 0x215   :  { %2247 = vmatpush3.bf16.msra.mxu1 %v2246_v59 }
 0x216   :  { %2248 = vmatprep.subr.bf16.mxu1 %v2494_v0 }
 0x219   :  { %2250 = vmatpush3.bf16.msra.mxu1 %v2249_v28 }
 0x21a   :  { %2251 = vmatprep.subr.bf16.mxu1 %v2494_v0 }
 0x21d   :  { %2253 = vmatpush3.bf16.msra.mxu1 %v2252_v37 }
 0x21e   :  { %2254 = vmatprep.subr.bf16.mxu1 %v2494_v0 }
 0x221   :  { %2256 = vmatpush3.bf16.msra.mxu1 %v2255_v39 }
 0x222   :  { %2257 = vmatprep.subr.bf16.mxu1 %v2494_v0 }
 0x225   :  { %2259 = vmatpush3.bf16.msra.mxu1 %v2258_v9 }
 0x226   :  { %2260 = vmatprep.subr.bf16.mxu1 %v2494_v0 }
 0x229   :  { %2262 = vmatpush3.bf16.msra.mxu1 %v2261_v15 }
 0x22a   :  { %2263 = vmatprep.subr.bf16.mxu1 %v2494_v0 }
 0x22d   :  { %2265 = vmatpush3.bf16.msra.mxu1 %v2264_v41 }
 0x22e   :  { %2266 = vmatprep.subr.bf16.mxu1 %v2494_v0 }
 0x230   :  { %1943 = vmatmul.mubr.f32.vlgmr.msra.gmra.mrb[0].mxu1 %v847_v57 }
 0x231   :  { %2268 = vmatpush3.bf16.msra.mxu1 %v2726_v47  ;;  %1977 = vmatprep.mubr.msk.f32.mxu1 %vm2495_vm0, %v2496_v1 }
 0x232   :  { %2269 = vmatprep.subr.bf16.mxu1 %v2494_v0 }
 0x235   :  { %2271 = vmatpush3.bf16.msra.mxu1 %v2736_v53 }
 0x236   :  { %2272 = vmatprep.subr.bf16.mxu1 %v2494_v0 }
 0x239   :  { %2274 = vmatpush3.bf16.msra.mxu1 %v2758_v5 }
 0x23a   :  { %2275 = vmatprep.subr.bf16.mxu1 %v2494_v0 }
 0x23d   :  { %2277 = vmatpush3.bf16.msra.mxu1 %v2765_v8 }
 0x23e   :  { %2278 = vmatprep.subr.bf16.mxu1 %v2494_v0 }
 0x241   :  { %2280 = vmatpush3.bf16.msra.mxu1 %v2772_v51 }
 0x242   :  { %2281 = vmatprep.subr.bf16.mxu1 %v2494_v0 }
 0x245   :  { %2283 = vmatpush3.bf16.msra.mxu1 %v2843_v45 }
 0x246   :  { %2284 = vmatprep.subr.bf16.mxu1 %v2494_v0 }
 0x249   :  { %2286 = vmatpush3.bf16.msra.mxu1 %v2847_v60 }
 0x24a   :  { %2287 = vmatprep.subr.bf16.mxu1 %v2494_v0 }
 0x24d   :  { %2289 = vmatpush3.bf16.msra.mxu1 %v2861_v34 }
 0x24e   :  { %2290 = vmatprep.subr.bf16.mxu1 %v2494_v0 }
 0x250   :  { %1978 = vmatmul.mubr.f32.vlgmr.msra.gmra.mrb[0].mxu1 %v848_v24 }
 0x251   :  { %2292 = vmatpush3.bf16.msra.mxu1 %v2291_v40  ;;  %2012 = vmatprep.mubr.msk.f32.mxu1 %vm2495_vm0, %v2496_v1 }
 0x252   :  { %2293 = vmatprep.subr.bf16.mxu1 %v2494_v0 }
 0x255   :  { %2295 = vmatpush3.bf16.msra.mxu1 %v2294_v17 }
 0x256   :  { %2296 = vmatprep.subr.bf16.mxu1 %v2494_v0 }
 0x259   :  { %2298 = vmatpush3.bf16.msra.mxu1 %v2297_v33 }
 0x25a   :  { %2299 = vmatprep.subr.bf16.mxu1 %v2494_v0 }
 0x25d   :  { %2301 = vmatpush3.bf16.msra.mxu1 %v2300_v42 }
 0x25e   :  { %2302 = vmatprep.subr.bf16.mxu1 %v2494_v0 }
 0x261   :  { %2304 = vmatpush3.bf16.msra.mxu1 %v2303_v48 }
 0x262   :  { %2305 = vmatprep.subr.bf16.mxu1 %v2494_v0 }
 0x265   :  { %2307 = vmatpush3.bf16.msra.mxu1 %v2306_v19 }
 0x266   :  { %2308 = vmatprep.subr.bf16.mxu1 %v2494_v0 }
 0x269   :  { %2310 = vmatpush3.bf16.msra.mxu1 %v2309_v44 }
 0x26a   :  { %2311 = vmatprep.subr.bf16.mxu1 %v2494_v0 }
 0x26d   :  { %2313 = vmatpush3.bf16.msra.mxu1 %v2312_v29 }
 0x26e   :  { %2314 = vmatprep.subr.bf16.mxu1 %v2494_v0 }
 0x270   :  { %2013 = vmatmul.mubr.f32.vlgmr.msra.gmra.mrb[0].mxu1 %v2954_v6 }
 0x271   :  { %2316 = vmatpush3.bf16.msra.mxu1 %v2726_v47  ;;  %2047 = vmatprep.mubr.msk.f32.mxu1 %vm2495_vm0, %v2496_v1  ;;  %v1425_v1 = vld [vmem:[%s3079_s5] ss:$0 sm:$0xff] }
 0x272   :  { %2317 = vmatprep.subr.bf16.mxu1 %v2494_v0 }
 0x275   :  { %2319 = vmatpush3.bf16.msra.mxu1 %v2736_v53 }
 0x276   :  { %2320 = vmatprep.subr.bf16.mxu1 %v2494_v0 }
 0x279   :  { %2322 = vmatpush3.bf16.msra.mxu1 %v2758_v5 }
 0x27a   :  { %2323 = vmatprep.subr.bf16.mxu1 %v2494_v0 }
 0x27d   :  { %2325 = vmatpush3.bf16.msra.mxu1 %v2765_v8 }
 0x27e   :  { %2326 = vmatprep.subr.bf16.mxu1 %v2494_v0 }
 0x281   :  { %2328 = vmatpush3.bf16.msra.mxu1 %v2772_v51 }
 0x282   :  { %2329 = vmatprep.subr.bf16.mxu1 %v2494_v0 }
 0x285   :  { %2331 = vmatpush3.bf16.msra.mxu1 %v2843_v45 }
 0x286   :  { %2332 = vmatprep.subr.bf16.mxu1 %v2494_v0 }
 0x289   :  { %2334 = vmatpush3.bf16.msra.mxu1 %v2847_v60 }
 0x28a   :  { %2335 = vmatprep.subr.bf16.mxu1 %v2494_v0 }
 0x28d   :  { %2337 = vmatpush3.bf16.msra.mxu1 %v2861_v34 }
 0x290   :  { %2048 = vmatmul.mubr.f32.vlgmr.msra.gmra.mrb[0].mxu1 %v2954_v6 }
 0x363   :  { %v1402_v47 = vpop.f32.mrb[0].mxu1 }
 0x364   :  { %v2339_v53 = vadd.f32 %v1425_v1, %v1402_v47  ;;  %v2049_v5 = vpop.f32.mrb[1].mxu1 }
 0x366   :  { %1406 = vst [vmem:[#allocation10] sm:$0xff] %v2339_v53 }
 0x367   :  { %2469 = shalt.err (!%p2466_p8)
}
 0x368   :  { %s2470_s27 = scalar_lea.hbm %s3080_s6, 128 }
 0x369   :  { %p2471_p9 = scmp.ne.s32.totalorder %s3080_s6, %s2470_s27  ;;  %p2474_p10 = scmp.lt.u32.totalorder %s2470_s27, %s3080_s6 }
 0x36b   :  { %p2476_p11 = pnand %p2474_p10, %p2471_p9 }
 0x36d   :  { %2479 = shalt.err (!%p2476_p11)
}
 0x36e   :  { %1416 = dma.vmem_to_hbm [thread:$0]  %s1414_s22, 128, %s3080_s6, [#allocation4]  }
 0x36f   :  { %2486 = dma.done.wait [#allocation4], 128  }
 0x370   :  { %2487 = vsyncadd [#allocation4], 4294967168 }
 0x371   :  { %1420 = vsyncpa [#allocation3], 1 }
 0x372   :  { %1421 = vsyncpa [#allocation6], 1 }
 0x373   :  { %1422 = vsyncpa [#allocation9], 1 }
 0x374   :  { %1423 = vsyncpa [#allocation4], 1 }

</bundles_post_ra>
